<compile_context>
chip_gen: v6e
topology: v6e:2x2x1
jax: 0.10.0
libtpu: 0.0.40
codegen_flags: <defaults>
</compile_context>

<pallas_src>
import functools

import jax
import jax.numpy as jnp
from jax import lax
from jax.experimental import pallas as pl
from jax.experimental.pallas import tpu as pltpu


def stn3d_kernel(x_ref, w1_ref, b1_ref, w2_ref, b2_ref, out_ref, acc_ref,
                 *, n_points):
    # x_ref  : (3, TN)    f32  current batch item, current N tile (N on lanes)
    # w1_ref : (128, 3)   f32  conv1 weight (out_ch, in_ch)
    # b1_ref : (128, 1)   f32  conv1 bias
    # w2_ref : (128, 9)   f32  fc weight, transposed
    # b2_ref : (1, 9)     f32  fc bias with flattened 3x3 identity folded in
    # out_ref: (1, 9)     f32  per-batch output row
    # acc_ref: (128, 128) f32  VMEM scratch: tn-independent running max
    n = pl.program_id(1)
    tn = x_ref.shape[-1]

    @pl.when(n == 0)
    def _init():
        acc_ref[...] = jnp.full(acc_ref.shape, -jnp.inf, acc_ref.dtype)

    x = x_ref[...]                                            # (3, TN)

    if n_points % tn != 0:
        # Partial last tile: replace out-of-range lanes by a valid point of
        # this tile (column 0 is always in-bounds). Duplicated points never
        # change a max, so no -inf masking of the (128, TN) activation needed.
        lane = lax.broadcasted_iota(jnp.int32, x.shape, 1)
        valid = (n * tn + lane) < n_points
        x = jnp.where(valid, x, x[:, 0:1])

    # Depth-3 contraction on the MXU (f32 accumulate); VPU only does the max.
    h = jnp.dot(w1_ref[...], x, preferred_element_type=jnp.float32)  # (128, TN)

    # Fold the TN/128 lane-column groups of h into the (128, 128) accumulator.
    m = acc_ref[...]
    for j in range(tn // 128):
        m = jnp.maximum(m, h[:, j * 128:(j + 1) * 128])
    acc_ref[...] = m

    @pl.when(n == pl.num_programs(1) - 1)
    def _finalize():
        # max_N relu(Wx + b1) == relu(max_N(Wx) + b1)  (relu monotone, b1 const)
        v = jnp.max(acc_ref[...], axis=1, keepdims=True)          # (128, 1) XLU
        v = jnp.maximum(v + b1_ref[...], 0.0)                     # (128, 1)
        # fc: y[j] = sum_k v[k] * w2[k, j]  (tiny, once per batch item)
        y = jnp.sum(v * w2_ref[...], axis=0, keepdims=True)       # (1, 9)
        out_ref[...] = y + b2_ref[...]                            # bias + identity


def stn3d_nobn(x, conv1_w, conv1_b, fc_w, fc_b, *, tile_n=8192):
    """x: (B, 3, N) float32 -> (B, 3, 3) float32, matching the PyTorch module."""
    B, C, N = x.shape
    assert C == 3
    x = x.astype(jnp.float32)

    # Point-dimension tile: multiple of 128 (lane width), capped at tile_n and
    # at the rounded-up point count. No wrapper-side padding; the remainder is
    # masked inside the kernel.
    n_128 = pl.cdiv(N, 128) * 128
    tn = max(128, min((int(tile_n) // 128) * 128, n_128))
    n_tiles = pl.cdiv(N, tn)

    # Parameter reshapes (cheap, done once in the wrapper).
    w1 = jnp.asarray(conv1_w[:, :, 0], jnp.float32)               # (128, 3)
    b1 = jnp.asarray(conv1_b, jnp.float32).reshape(128, 1)        # (128, 1)
    w2 = jnp.asarray(fc_w, jnp.float32).T                         # (128, 9)
    # Fold y[:,0]+=1, y[:,4]+=1, y[:,8]+=1 into the fc bias.
    b2 = (jnp.asarray(fc_b, jnp.float32)
          + jnp.eye(3, dtype=jnp.float32).reshape(9)).reshape(1, 9)

    # Explicit scoped-VMEM budget with headroom (double-buffered x tile, MXU
    # result temp, accumulator, resident params), capped below v7x physical.
    vmem_bytes = 4 * (2 * 3 * tn            # double-buffered x tile
                      + 128 * tn            # (128, tn) MXU result temp
                      + 128 * 128           # running-max accumulator
                      + 2 * (128 * 3 + 128 + 128 * 9 + 9)   # params
                      + 16)
    vmem_limit = int(min(max(2 * vmem_bytes + (4 << 20), 16 << 20), 32 << 20))

    flops = 2 * B * N * 3 * 128 + 2 * B * 128 * 9
    bytes_accessed = (x.size + w1.size + b1.size + w2.size + b2.size + B * 9) * 4

    kernel = functools.partial(stn3d_kernel, n_points=N)

    out = pl.pallas_call(
        kernel,
        out_shape=jax.ShapeDtypeStruct((B, 1, 9), jnp.float32),
        grid_spec=pltpu.PrefetchScalarGridSpec(
            num_scalar_prefetch=0,
            grid=(B, n_tiles),
            in_specs=[
                pl.BlockSpec((None, 3, tn), lambda b, n: (b, 0, n)),  # x
                pl.BlockSpec((128, 3), lambda b, n: (0, 0)),          # w1 (resident)
                pl.BlockSpec((128, 1), lambda b, n: (0, 0)),          # b1
                pl.BlockSpec((128, 9), lambda b, n: (0, 0)),          # w2
                pl.BlockSpec((1, 9), lambda b, n: (0, 0)),            # b2 (+identity)
            ],
            out_specs=pl.BlockSpec((None, 1, 9), lambda b, n: (b, 0, 0)),
            scratch_shapes=[pltpu.VMEM((128, 128), jnp.float32)],     # running max
        ),
        compiler_params=pltpu.CompilerParams(
            dimension_semantics=("parallel", "arbitrary"),
            vmem_limit_bytes=vmem_limit),
        cost_estimate=pl.CostEstimate(
            flops=flops, transcendentals=0, bytes_accessed=bytes_accessed),
    )(x, w1, b1, w2, b2)

    return out.reshape(B, 3, 3)


def init_params(key):
    """Deterministic synthetic parameters with the module's shapes:
       Conv1d(3, 128, 1): weight (128, 3, 1), bias (128,)
       Linear(128, 9)   : weight (9, 128),    bias (9,)"""
    k1, k2, k3, k4 = jax.random.split(key, 4)
    conv1_w = jax.random.normal(k1, (128, 3, 1), jnp.float32) * 0.1
    conv1_b = jax.random.normal(k2, (128,), jnp.float32) * 0.1
    fc_w = jax.random.normal(k3, (9, 128), jnp.float32) * 0.05
    fc_b = jax.random.normal(k4, (9,), jnp.float32) * 0.05
    return conv1_w, conv1_b, fc_w, fc_b


if __name__ == "__main__":
    key = jax.random.PRNGKey(0)
    k_params, k_x = jax.random.split(key)

    conv1_w, conv1_b, fc_w, fc_b = init_params(k_params)

    # Small but realistic PointNet-ish shapes; N=2500 is not a multiple of 128,
    # so the in-kernel remainder masking path is exercised.
    B, C, N = 2, 3, 2500
    x = jax.random.normal(k_x, (B, C, N), jnp.float32)

    # Pure-JAX reference of the same math (exact-precision contractions).
    h_ref = jnp.maximum(
        jnp.einsum("bcn,kc->bkn", x, conv1_w[:, :, 0], precision="highest")
        + conv1_b[None, :, None], 0.0)
    m_ref = jnp.max(h_ref, axis=2)
    y_ref = (jnp.dot(m_ref, fc_w.T, precision="highest") + fc_b
             + jnp.eye(3, dtype=jnp.float32).reshape(9)).reshape(B, 3, 3)

    # Default (large) tile: single tile per batch item + remainder mask.
    out_big = jax.block_until_ready(stn3d_nobn(x, conv1_w, conv1_b, fc_w, fc_b))
    # Small tile: exercises the multi-tile running-max accumulation path.
    out_small = jax.block_until_ready(
        stn3d_nobn(x, conv1_w, conv1_b, fc_w, fc_b, tile_n=1024))

    assert out_big.shape == (B, 3, 3)
    assert jnp.allclose(out_big, y_ref, atol=1e-4, rtol=1e-4)
    assert jnp.allclose(out_small, y_ref, atol=1e-4, rtol=1e-4)

    print("KERNEL_OK")
</pallas_src>

<mosaic_0001>
module attributes {stable_mosaic.version = 11 : i64} {
  func.func @stn3d_kernel(%arg0: i32, %arg1: i32, %arg2: memref<1x3x2560xf32, #tpu.memory_space<vmem>>, %arg3: memref<128x3xf32, #tpu.memory_space<vmem>>, %arg4: memref<128x1xf32, #tpu.memory_space<vmem>>, %arg5: memref<128x9xf32, #tpu.memory_space<vmem>>, %arg6: memref<1x9xf32, #tpu.memory_space<vmem>>, %arg7: memref<1x1x9xf32, #tpu.memory_space<vmem>>, %arg8: memref<128x128xf32, #tpu.memory_space<vmem>>) attributes {dimension_semantics = [#tpu.dimension_semantics<parallel>, #tpu.dimension_semantics<arbitrary>], iteration_bounds = array<i64: 2, 1>, scalar_prefetch = 0 : i64, scratch_operands = 1 : i64, tpu.core_type = #tpu.core_type<tc>, window_params = [{transform_indices = @transform_0, window_bounds = array<i64: 1, 3, 2560>}, {pipeline_mode = #tpu.pipeline_mode<synchronous>, transform_indices = @transform_1, window_bounds = array<i64: 128, 3>}, {pipeline_mode = #tpu.pipeline_mode<synchronous>, transform_indices = @transform_2, window_bounds = array<i64: 128, 1>}, {pipeline_mode = #tpu.pipeline_mode<synchronous>, transform_indices = @transform_3, window_bounds = array<i64: 128, 9>}, {pipeline_mode = #tpu.pipeline_mode<synchronous>, transform_indices = @transform_4, window_bounds = array<i64: 1, 9>}, {transform_indices = @transform_5, window_bounds = array<i64: 1, 1, 9>}]} {
    %c0_i32 = arith.constant 0 : i32
    %0 = arith.cmpi eq, %arg1, %c0_i32 : i32
    %1 = arith.extui %0 : i1 to i32
    %c0_i32_0 = arith.constant 0 : i32
    %2 = arith.cmpi ne, %1, %c0_i32_0 : i32
    scf.if %2 {
      %cst_11 = arith.constant 0xFF800000 : f32
      %62 = vector.broadcast %cst_11 : f32 to vector<128x128xf32>
      %c0_12 = arith.constant 0 : index
      %c0_13 = arith.constant 0 : index
      %63 = vector.load %arg8[%c0_12, %c0_13] : memref<128x128xf32, #tpu.memory_space<vmem>>, vector<128x128xf32>
      tpu.vector_store %arg8[%c0_12, %c0_13], %62 {strides = array<i32>} : memref<128x128xf32, #tpu.memory_space<vmem>>, vector<128x128xf32>,
    } else {
    }
    %c0 = arith.constant 0 : index
    %c0_1 = arith.constant 0 : index
    %c0_2 = arith.constant 0 : index
    %3 = vector.load %arg2[%c0, %c0_1, %c0_2] : memref<1x3x2560xf32, #tpu.memory_space<vmem>>, vector<1x3x2560xf32>
    %4 = vector.shape_cast %3 : vector<1x3x2560xf32> to vector<3x2560xf32>
    %5 = tpu.iota {dimensions = array<i32: 1>} : vector<3x2560xi32>
    %c2560_i32 = arith.constant 2560 : i32
    %6 = arith.muli %arg1, %c2560_i32 : i32
    %7 = vector.broadcast %6 : i32 to vector<3x2560xi32>
    %8 = arith.addi %7, %5 : vector<3x2560xi32>
    %c2500_i32 = arith.constant 2500 : i32
    %9 = vector.broadcast %c2500_i32 : i32 to vector<3x2560xi32>
    %10 = arith.cmpi slt, %8, %9 : vector<3x2560xi32>
    %11 = vector.extract_strided_slice %4 {offsets = [0, 0], sizes = [3, 1], strides = [1, 1]} : vector<3x2560xf32> to vector<3x1xf32>
    %12 = vector.shape_cast %11 : vector<3x1xf32> to vector<3x1xf32>
    %13 = vector.broadcast %12 : vector<3x1xf32> to vector<3x2560xf32>
    %14 = arith.select %10, %4, %13 : vector<3x2560xi1>, vector<3x2560xf32>
    %c0_3 = arith.constant 0 : index
    %c0_4 = arith.constant 0 : index
    %15 = vector.load %arg3[%c0_3, %c0_4] : memref<128x3xf32, #tpu.memory_space<vmem>>, vector<128x3xf32>
    %cst = arith.constant dense<0.000000e+00> : vector<128x2560xf32>
    %16 = tpu.matmul %15, %14, %cst {dimension_numbers = #tpu.dot_dimension_numbers<[1], [0], [0], [1], [0, 0, 1, 1], [], []>} : vector<128x3xf32>, vector<3x2560xf32>, vector<128x2560xf32> -> vector<128x2560xf32>
    %c0_5 = arith.constant 0 : index
    %c0_6 = arith.constant 0 : index
    %17 = vector.load %arg8[%c0_5, %c0_6] : memref<128x128xf32, #tpu.memory_space<vmem>>, vector<128x128xf32>
    %18 = vector.extract_strided_slice %16 {offsets = [0, 0], sizes = [128, 128], strides = [1, 1]} : vector<128x2560xf32> to vector<128x128xf32>
    %19 = arith.maximumf %17, %18 : vector<128x128xf32>
    %20 = vector.extract_strided_slice %16 {offsets = [0, 128], sizes = [128, 128], strides = [1, 1]} : vector<128x2560xf32> to vector<128x128xf32>
    %21 = arith.maximumf %19, %20 : vector<128x128xf32>
    %22 = vector.extract_strided_slice %16 {offsets = [0, 256], sizes = [128, 128], strides = [1, 1]} : vector<128x2560xf32> to vector<128x128xf32>
    %23 = arith.maximumf %21, %22 : vector<128x128xf32>
    %24 = vector.extract_strided_slice %16 {offsets = [0, 384], sizes = [128, 128], strides = [1, 1]} : vector<128x2560xf32> to vector<128x128xf32>
    %25 = arith.maximumf %23, %24 : vector<128x128xf32>
    %26 = vector.extract_strided_slice %16 {offsets = [0, 512], sizes = [128, 128], strides = [1, 1]} : vector<128x2560xf32> to vector<128x128xf32>
    %27 = arith.maximumf %25, %26 : vector<128x128xf32>
    %28 = vector.extract_strided_slice %16 {offsets = [0, 640], sizes = [128, 128], strides = [1, 1]} : vector<128x2560xf32> to vector<128x128xf32>
    %29 = arith.maximumf %27, %28 : vector<128x128xf32>
    %30 = vector.extract_strided_slice %16 {offsets = [0, 768], sizes = [128, 128], strides = [1, 1]} : vector<128x2560xf32> to vector<128x128xf32>
    %31 = arith.maximumf %29, %30 : vector<128x128xf32>
    %32 = vector.extract_strided_slice %16 {offsets = [0, 896], sizes = [128, 128], strides = [1, 1]} : vector<128x2560xf32> to vector<128x128xf32>
    %33 = arith.maximumf %31, %32 : vector<128x128xf32>
    %34 = vector.extract_strided_slice %16 {offsets = [0, 1024], sizes = [128, 128], strides = [1, 1]} : vector<128x2560xf32> to vector<128x128xf32>
    %35 = arith.maximumf %33, %34 : vector<128x128xf32>
    %36 = vector.extract_strided_slice %16 {offsets = [0, 1152], sizes = [128, 128], strides = [1, 1]} : vector<128x2560xf32> to vector<128x128xf32>
    %37 = arith.maximumf %35, %36 : vector<128x128xf32>
    %38 = vector.extract_strided_slice %16 {offsets = [0, 1280], sizes = [128, 128], strides = [1, 1]} : vector<128x2560xf32> to vector<128x128xf32>
    %39 = arith.maximumf %37, %38 : vector<128x128xf32>
    %40 = vector.extract_strided_slice %16 {offsets = [0, 1408], sizes = [128, 128], strides = [1, 1]} : vector<128x2560xf32> to vector<128x128xf32>
    %41 = arith.maximumf %39, %40 : vector<128x128xf32>
    %42 = vector.extract_strided_slice %16 {offsets = [0, 1536], sizes = [128, 128], strides = [1, 1]} : vector<128x2560xf32> to vector<128x128xf32>
    %43 = arith.maximumf %41, %42 : vector<128x128xf32>
    %44 = vector.extract_strided_slice %16 {offsets = [0, 1664], sizes = [128, 128], strides = [1, 1]} : vector<128x2560xf32> to vector<128x128xf32>
    %45 = arith.maximumf %43, %44 : vector<128x128xf32>
    %46 = vector.extract_strided_slice %16 {offsets = [0, 1792], sizes = [128, 128], strides = [1, 1]} : vector<128x2560xf32> to vector<128x128xf32>
    %47 = arith.maximumf %45, %46 : vector<128x128xf32>
    %48 = vector.extract_strided_slice %16 {offsets = [0, 1920], sizes = [128, 128], strides = [1, 1]} : vector<128x2560xf32> to vector<128x128xf32>
    %49 = arith.maximumf %47, %48 : vector<128x128xf32>
    %50 = vector.extract_strided_slice %16 {offsets = [0, 2048], sizes = [128, 128], strides = [1, 1]} : vector<128x2560xf32> to vector<128x128xf32>
    %51 = arith.maximumf %49, %50 : vector<128x128xf32>
    %52 = vector.extract_strided_slice %16 {offsets = [0, 2176], sizes = [128, 128], strides = [1, 1]} : vector<128x2560xf32> to vector<128x128xf32>
    %53 = arith.maximumf %51, %52 : vector<128x128xf32>
    %54 = vector.extract_strided_slice %16 {offsets = [0, 2304], sizes = [128, 128], strides = [1, 1]} : vector<128x2560xf32> to vector<128x128xf32>
    %55 = arith.maximumf %53, %54 : vector<128x128xf32>
    %56 = vector.extract_strided_slice %16 {offsets = [0, 2432], sizes = [128, 128], strides = [1, 1]} : vector<128x2560xf32> to vector<128x128xf32>
    %57 = arith.maximumf %55, %56 : vector<128x128xf32>
    %c0_7 = arith.constant 0 : index
    %c0_8 = arith.constant 0 : index
    %58 = vector.load %arg8[%c0_7, %c0_8] : memref<128x128xf32, #tpu.memory_space<vmem>>, vector<128x128xf32>
    tpu.vector_store %arg8[%c0_7, %c0_8], %57 {strides = array<i32>} : memref<128x128xf32, #tpu.memory_space<vmem>>, vector<128x128xf32>,
    %c0_i32_9 = arith.constant 0 : i32
    %59 = arith.cmpi eq, %arg1, %c0_i32_9 : i32
    %60 = arith.extui %59 : i1 to i32
    %c0_i32_10 = arith.constant 0 : i32
    %61 = arith.cmpi ne, %60, %c0_i32_10 : i32
    scf.if %61 {
      %c0_11 = arith.constant 0 : index
      %c0_12 = arith.constant 0 : index
      %62 = vector.load %arg8[%c0_11, %c0_12] : memref<128x128xf32, #tpu.memory_space<vmem>>, vector<128x128xf32>
      %cst_13 = arith.constant dense<0xFF800000> : vector<128xf32>
      %63 = vector.multi_reduction <maximumf>, %62, %cst_13 [1] : vector<128x128xf32> to vector<128xf32>
      %64 = vector.shape_cast %63 : vector<128xf32> to vector<128x1xf32>
      %c0_14 = arith.constant 0 : index
      %c0_15 = arith.constant 0 : index
      %65 = vector.load %arg4[%c0_14, %c0_15] : memref<128x1xf32, #tpu.memory_space<vmem>>, vector<128x1xf32>
      %66 = arith.addf %64, %65 : vector<128x1xf32>
      %cst_16 = arith.constant 0.000000e+00 : f32
      %67 = vector.broadcast %cst_16 : f32 to vector<128x1xf32>
      %68 = arith.maximumf %66, %67 : vector<128x1xf32>
      %c0_17 = arith.constant 0 : index
      %c0_18 = arith.constant 0 : index
      %69 = vector.load %arg5[%c0_17, %c0_18] : memref<128x9xf32, #tpu.memory_space<vmem>>, vector<128x9xf32>
      %70 = vector.broadcast %68 : vector<128x1xf32> to vector<128x9xf32>
      %71 = arith.mulf %70, %69 : vector<128x9xf32>
      %cst_19 = arith.constant dense<0.000000e+00> : vector<9xf32>
      %72 = vector.multi_reduction <add>, %71, %cst_19 [0] : vector<128x9xf32> to vector<9xf32>
      %73 = vector.shape_cast %72 : vector<9xf32> to vector<1x9xf32>
      %c0_20 = arith.constant 0 : index
      %c0_21 = arith.constant 0 : index
      %74 = vector.load %arg6[%c0_20, %c0_21] : memref<1x9xf32, #tpu.memory_space<vmem>>, vector<1x9xf32>
      %75 = arith.addf %73, %74 : vector<1x9xf32>
      %c0_22 = arith.constant 0 : index
      %c0_23 = arith.constant 0 : index
      %c0_24 = arith.constant 0 : index
      %76 = vector.load %arg7[%c0_22, %c0_23, %c0_24] : memref<1x1x9xf32, #tpu.memory_space<vmem>>, vector<1x1x9xf32>
      %77 = vector.shape_cast %76 : vector<1x1x9xf32> to vector<1x9xf32>
      %78 = vector.shape_cast %75 : vector<1x9xf32> to vector<1x1x9xf32>
      tpu.vector_store %arg7[%c0_22, %c0_23, %c0_24], %78 {strides = array<i32>} : memref<1x1x9xf32, #tpu.memory_space<vmem>>, vector<1x1x9xf32>,
    } else {
    }
    return
  }
  func.func @transform_0(%arg0: i32, %arg1: i32) -> (i32, i32, i32) {
    %c0_i32 = arith.constant 0 : i32
    %c0_i32_0 = arith.constant 0 : i32
    return %arg0, %c0_i32, %arg1 : i32, i32, i32
  }
  func.func @transform_1(%arg0: i32, %arg1: i32) -> (i32, i32) {
    %c0_i32 = arith.constant 0 : i32
    %c0_i32_0 = arith.constant 0 : i32
    %c0_i32_1 = arith.constant 0 : i32
    return %c0_i32, %c0_i32_0 : i32, i32
  }
  func.func @transform_2(%arg0: i32, %arg1: i32) -> (i32, i32) {
    %c0_i32 = arith.constant 0 : i32
    %c0_i32_0 = arith.constant 0 : i32
    %c0_i32_1 = arith.constant 0 : i32
    return %c0_i32, %c0_i32_0 : i32, i32
  }
  func.func @transform_3(%arg0: i32, %arg1: i32) -> (i32, i32) {
    %c0_i32 = arith.constant 0 : i32
    %c0_i32_0 = arith.constant 0 : i32
    %c0_i32_1 = arith.constant 0 : i32
    return %c0_i32, %c0_i32_0 : i32, i32
  }
  func.func @transform_4(%arg0: i32, %arg1: i32) -> (i32, i32) {
    %c0_i32 = arith.constant 0 : i32
    %c0_i32_0 = arith.constant 0 : i32
    %c0_i32_1 = arith.constant 0 : i32
    return %c0_i32, %c0_i32_0 : i32, i32
  }
  func.func @transform_5(%arg0: i32, %arg1: i32) -> (i32, i32, i32) {
    %c0_i32 = arith.constant 0 : i32
    %c0_i32_0 = arith.constant 0 : i32
    %c0_i32_1 = arith.constant 0 : i32
    return %arg0, %c0_i32, %c0_i32_0 : i32, i32, i32
  }
}

</mosaic_0001>

<bundles_post_ra>
// kernel: tpu_custom_call.1
= control target key start
LH: loop header
LB: loop body
LE: loop exit
PB: predicated region body
PF: predicated region fallthrough
CT: control target
= control target key end

     0   :  { %10 = vsyncpa [#allocation4], 0  ;;  %s4651_s0 = inlined_call_operand.vmem [shape: f32[2,3,2500], index: 0, kind: input, shape index: {}]   ;;  %s4652_s1 = inlined_call_operand.vmem [shape: f32[128,3], index: 1, kind: input, shape index: {}]   ;;  %s4653_s2 = inlined_call_operand.vmem [shape: f32[128,1], index: 2, kind: input, shape index: {}]   ;;  %s4654_s3 = inlined_call_operand.vmem [shape: f32[128,9], index: 3, kind: input, shape index: {}]   ;;  %s4655_s4 = inlined_call_operand.vmem [shape: f32[1,9], index: 4, kind: input, shape index: {}]   ;;  %s4656_s5 = inlined_call_operand.hbm [shape: f32[2,1,9], index: 5, kind: output, shape index: {}]  }
   0x1   :  { %12 = vsyncpa [#allocation4 + $0x1], 0  ;;  %s3205_s18 = smov 0   ;;  %s3207_s19 = smov 0  }
   0x2   :  { %s3209_s20 = smov 0   ;;  %s3211_s21 = smov 0  }
   0x3   :  { %s3213_s22 = smov 0   ;;  %s3215_s23 = smov 0  }
   0x4 LB: > { %s2830_s24 = sadd.s32 4294967295, %s3169_s23   ;;  %s2831_s25 = sadd.s32 4294967294, %s3169_s23   ;;  %s3169_s23 = sphi %s3215_s23, %s18_s23   ;;  %s3165_s22 = sphi %s3213_s22, %s4766_s22   ;;  %s3161_s21 = sphi %s3211_s21, %s4765_s21   ;;  %s3157_s20 = sphi %s3209_s20, %s4764_s20   ;;  %s3153_s19 = sphi %s3207_s19, %s4763_s19   ;;  %s3149_s18 = sphi %s3205_s18, %s4762_s18  }
   0x5   : > { %s30_s26 = sadd.s32 1, %s3165_s22  ;;  %s149_s27 = sadd.s32 1, %s3157_s20 }
   0x6   : > { %p32_p0 = scmp.ge.s32.totalorder %s30_s26, 2  ;;  %p159_p1 = scmp.ne.s32.totalorder %s3157_s20, %s3153_s19 }
   0x7   : > { %p160_p2 = scmp.eq.s32.totalorder %s2830_s24, 1  ;;  %p165_p3 = scmp.ne.s32.totalorder %s3153_s19, %s3149_s18 }
   0x8   : > { %s4768_s26 = smov (%p32_p0, %s30_s26), 0  ;;  %p166_p5 = scmp.eq.s32.totalorder %s2831_s25, 1 }
   0x9   : > { %p3245_p4 = por %p160_p2, %p159_p1  ;;  %s146_s29 = ssub.s32 %s3165_s22, %s4768_s26 }
   0xa   : > { %p2834_p6 = scmp.ge.s32.totalorder %s3169_s23, 1  ;;  %p147_p7 = scmp.eq.s32.totalorder %s146_s29, 0 }
   0xb   : > { %p3252_p8 = por %p166_p5, %p165_p3  ;;  %p209_p9 = scmp.lt.s32.totalorder %s3169_s23, 3 }
   0xc   : > { %s3258_s6 = scalar_select %p147_p7, %s3157_s20, %s149_s27  }
   0xd   : > { %p210_p10 = pnand %p2834_p6, %p209_p9 }
   0xf   : > { %213 = sbr.rel (%p210_p10) target bundleno = 847 (0x34f), region = 40 }
  0x14   : > { %p241_p11 = scmp.lt.s32.totalorder %s3161_s21, 1  ;;  %v3171_v0 = vmov 0.0   ;;  %v3172_v1 = vmov 0   ;;  %vm472_vm0 = vcmask 1042432   ;;  %v3276_v9 = vld [vmem:[%s4652_s1] sm:$0xff]  ;;  %vm423_vm1 = vcmask 23552  }
  0x15   : > { %597 = vmatprep.mubr.f32.mxu0 %v3171_v0  ;;  %758 = vmatprep.mubr.f32.mxu1 %v3171_v0  ;;  %v3298_v14 = vld [vmem:[%s4652_s1 + $0x8] sm:$0xff]  ;;  %v3314_v16 = vld [vmem:[%s4652_s1 + $0x10] sm:$0xff]  ;;  %v3326_v17 = vld [vmem:[%s4652_s1 + $0x18] sm:$0xff]  ;;  %v280_v34 = vlaneseq  ;;  %v3173_v35 = vmov 839922192   ;;  %vm2706_vm3 = vcmask 72704  }
  0x16   : > { %s242_s7 = scalar_select %p241_p11, %s3161_s21, 1  ;;  %3078 = vset.pattern.permute.xlu0 %v3172_v1  ;;  %3079 = vset.pattern.permute.xlu1 %v3172_v1  ;;  %v3337_v18 = vld [vmem:[%s4652_s1 + $0x20] sm:$0xff]  ;;  %v3348_v19 = vld [vmem:[%s4652_s1 + $0x28] sm:$0xff]  ;;  %v3359_v20 = vld [vmem:[%s4652_s1 + $0x30] sm:$0xff]  ;;  %v349_v36 = vunpack.c.l.s4 %v3173_v35  ;;  %vm2746_vm4 = vcmask 65536  }
  0x17   : > { %v3370_v21 = vld [vmem:[%s4652_s1 + $0x38] sm:$0xff]  ;;  %v3381_v22 = vld [vmem:[%s4652_s1 + $0x40] sm:$0xff]  ;;  %v3392_v23 = vld [vmem:[%s4652_s1 + $0x48] sm:$0xff]  ;;  %v352_v38 = vshrl.u32 %v280_v34, 7  ;;  %v281_v40 = vand.u32 127, %v280_v34  ;;  %s238_s10 = sand.u32 1, %s3153_s19  }
  0x18   : > { %s3019_s8 = smul.u32 80, %s242_s7  ;;  %v3403_v24 = vld [vmem:[%s4652_s1 + $0x50] sm:$0xff]  ;;  %v3414_v25 = vld [vmem:[%s4652_s1 + $0x58] sm:$0xff]  ;;  %v3425_v26 = vld [vmem:[%s4652_s1 + $0x60] sm:$0xff]  ;;  %v350_v37 = vunpack.c.0.s8 %v349_v36  ;;  %s3016_s14 = sshll.u32 %s3161_s21, 4 }
  0x19   : > { %v3436_v27 = vld [vmem:[%s4652_s1 + $0x68] sm:$0xff]  ;;  %v3447_v28 = vld [vmem:[%s4652_s1 + $0x70] sm:$0xff]  ;;  %v3458_v29 = vld [vmem:[%s4652_s1 + $0x78] sm:$0xff]  ;;  %v300_v44 = vadd.s32 2432, %v281_v40  ;;  %s239_s15 = scalar_lea.vmem [#allocation3], %s238_s10  ;;  %s2759_s24 = scalar_lea.hbm %s4656_s5, %s3016_s14 }
  0x1a   : > { %s3267_s11 = scalar_lea.vmem %s4651_s0, %s3019_s8  ;;  %v353_v39 = vsub.s32 %v350_v37, %v352_v38  ;;  %s2749_s25 = scalar_lea.sflag [#allocation4], %s238_s10 }
  0x1b   : > { %v270_v2 = vld [vmem:[%s3267_s11] sm:$0x77]  ;;  %v272_v3 = vld [vmem:[%s3267_s11 + $0x10] sm:$0x77]  ;;  %v271_v4 = vld [vmem:[%s3267_s11 + $0x8] sm:$0x77] }
  0x1c   : > { %v364_v5 = vcombine.high %v270_v2, %v270_v2  ;;  %v366_v6 = vcombine.high %v272_v3, %v272_v3  ;;  %v365_v7 = vcombine.high %v271_v4, %v271_v4  ;;  %v273_v8 = vld [vmem:[%s3267_s11 + $0x18] sm:$0x77]  ;;  %345 = vperm.xlu0 %3078, %v270_v2   ;;  %v3279_v10 = vld [vmem:[%s3267_s11 + $0x20] sm:$0x77]  ;;  %v3284_v12 = vld [vmem:[%s3267_s11 + $0x28] sm:$0x77] }
  0x1d   : > { %v367_v11 = vcombine.high %v273_v8, %v273_v8  ;;  %v368_v13 = vcombine.high %v3279_v10, %v3279_v10  ;;  %v369_v15 = vcombine.high %v3284_v12, %v3284_v12  ;;  %v3464_v30 = vld [vmem:[%s3267_s11 + $0x30] sm:$0x77]  ;;  %v3470_v31 = vld [vmem:[%s3267_s11 + $0x38] sm:$0x77]  ;;  %v3575_v43 = vld [vmem:[%s3267_s11 + $0x48] sm:$0x77] }
  0x1e   : > { %2836 = vmatprep.subr.msk.mxu0 %vm472_vm0, %v364_v5  ;;  %2854 = vmatprep.subr.msk.mxu1 %vm472_vm0, %v365_v7  ;;  %v370_v32 = vcombine.high %v3464_v30, %v3464_v30  ;;  %v371_v33 = vcombine.high %v3470_v31, %v3470_v31  ;;  %v3579_v45 = vld [vmem:[%s3267_s11 + $0x40] sm:$0x77]  ;;  %v373_v47 = vcombine.high %v3575_v43, %v3575_v43  ;;  %vm342_vm2 = vcmp.lt.s32.totalorder %v300_v44, 2500  ;;  %s2761_s11 = sshll.u32 %s239_s15, 4  ;;  %s3174_s29 = smov [#allocation3]   ;;  %s2762_s11 = int_to_ptr.vmem [resolvable:$true] %s2761_s11 }
  0x1f   : > { %2837 = vmatpush1.msk.msra.mxu0 %vm472_vm0, %v270_v2  ;;  %2855 = vmatpush1.msk.msra.mxu1 %vm472_vm0, %v271_v4  ;;  %v372_v48 = vcombine.high %v3579_v45, %v3579_v45  ;;  %s3093_s27 = scalar_lea.vmem %s2762_s11, 16  ;;  %s3097_s7 = sshll.u32 %s3174_s29, 4  ;;  %s3098_s7 = int_to_ptr.vmem [resolvable:$false] %s3097_s7 }
  0x20   : > { %2838 = vmatmul.mubr.msk.f32.vlgmr.msra.gmra.mxu0 %vm423_vm1, %v3276_v9  ;;  %2872 = vmatprep.subr.msk.mxu0 %vm472_vm0, %v366_v6  ;;  %p3094_p12 = scmp.ne.s32.totalorder %s2762_s11, %s3093_s27  ;;  %s3099_s21 = scalar_lea.vmem %s3098_s7, 32 }
  0x21   : > { %2873 = vmatpush1.msk.msra.mxu0 %vm472_vm0, %v272_v3  ;;  %603 = vmatprep.mubr.f32.mxu0 %v3171_v0  ;;  %p3100_p1 = scmp.lt.s32.totalorder %s2762_s11, %s3098_s7  ;;  %p3101_p2 = scmp.lt.s32.totalorder %s3099_s21, %s3093_s27 }
  0x22   : > { %2856 = vmatmul.mubr.msk.f32.vlgmr.msra.gmra.mxu1 %vm423_vm1, %v3276_v9  ;;  %2890 = vmatprep.subr.msk.mxu1 %vm472_vm0, %v367_v11  ;;  %p3095_p13 = pnand %p3094_p12, %p3245_p4 }
  0x23   : > { %2891 = vmatpush1.msk.msra.mxu1 %vm472_vm0, %v273_v8  ;;  %764 = vmatprep.mubr.f32.mxu1 %v3171_v0  ;;  %p3102_p3 = por %p3101_p2, %p3100_p1 }
  0x24   : > { %2839 = vmatmul.mubr.msk.f32.gmra.mxu0 %vm423_vm1, %v3298_v14  ;;  %2908 = vmatprep.subr.msk.mxu0 %vm472_vm0, %v368_v13  ;;  %p3096_p0 = pneg %p3095_p13 }
  0x25   : > { %609 = vmatprep.mubr.f32.mxu0 %v3171_v0  ;;  %2926 = vmatprep.subr.msk.mxu1 %vm472_vm0, %v369_v15 }
  0x26   : > { %2857 = vmatmul.mubr.msk.f32.gmra.mxu1 %vm423_vm1, %v3298_v14  ;;  %p3103_p5 = pnand %p3102_p3, %p3096_p0 }
  0x27   : > { %770 = vmatprep.mubr.f32.mxu1 %v3171_v0 }
  0x28   : > { %2840 = vmatmul.mubr.msk.f32.gmra.mxu0 %vm423_vm1, %v3314_v16 }
  0x29   : > { %615 = vmatprep.mubr.f32.mxu0 %v3171_v0 }
  0x2a   : > { %2858 = vmatmul.mubr.msk.f32.gmra.mxu1 %vm423_vm1, %v3314_v16 }
  0x2b   : > { %776 = vmatprep.mubr.f32.mxu1 %v3171_v0 }
  0x2c   : > { %2841 = vmatmul.mubr.msk.f32.gmra.mxu0 %vm423_vm1, %v3326_v17 }
  0x2d   : > { %621 = vmatprep.mubr.f32.mxu0 %v3171_v0 }
  0x2e   : > { %2859 = vmatmul.mubr.msk.f32.gmra.mxu1 %vm423_vm1, %v3326_v17 }
  0x2f   : > { %782 = vmatprep.mubr.f32.mxu1 %v3171_v0 }
  0x30   : > { %2842 = vmatmul.mubr.msk.f32.gmra.mxu0 %vm423_vm1, %v3337_v18 }
  0x31   : > { %627 = vmatprep.mubr.f32.mxu0 %v3171_v0 }
  0x32   : > { %2860 = vmatmul.mubr.msk.f32.gmra.mxu1 %vm423_vm1, %v3337_v18 }
  0x33   : > { %788 = vmatprep.mubr.f32.mxu1 %v3171_v0 }
  0x34   : > { %2843 = vmatmul.mubr.msk.f32.gmra.mxu0 %vm423_vm1, %v3348_v19 }
  0x35   : > { %633 = vmatprep.mubr.f32.mxu0 %v3171_v0 }
  0x36   : > { %2861 = vmatmul.mubr.msk.f32.gmra.mxu1 %vm423_vm1, %v3348_v19 }
  0x37   : > { %794 = vmatprep.mubr.f32.mxu1 %v3171_v0 }
  0x38   : > { %2844 = vmatmul.mubr.msk.f32.gmra.mxu0 %vm423_vm1, %v3359_v20 }
  0x39   : > { %639 = vmatprep.mubr.f32.mxu0 %v3171_v0 }
  0x3a   : > { %2862 = vmatmul.mubr.msk.f32.gmra.mxu1 %vm423_vm1, %v3359_v20 }
  0x3b   : > { %800 = vmatprep.mubr.f32.mxu1 %v3171_v0 }
  0x3c   : > { %2845 = vmatmul.mubr.msk.f32.gmra.mxu0 %vm423_vm1, %v3370_v21 }
  0x3d   : > { %645 = vmatprep.mubr.f32.mxu0 %v3171_v0 }
  0x3e   : > { %2863 = vmatmul.mubr.msk.f32.gmra.mxu1 %vm423_vm1, %v3370_v21 }
  0x3f   : > { %806 = vmatprep.mubr.f32.mxu1 %v3171_v0 }
  0x40   : > { %2846 = vmatmul.mubr.msk.f32.gmra.mxu0 %vm423_vm1, %v3381_v22 }
  0x41   : > { %651 = vmatprep.mubr.f32.mxu0 %v3171_v0 }
  0x42   : > { %2864 = vmatmul.mubr.msk.f32.gmra.mxu1 %vm423_vm1, %v3381_v22 }
  0x43   : > { %812 = vmatprep.mubr.f32.mxu1 %v3171_v0 }
  0x44   : > { %2847 = vmatmul.mubr.msk.f32.gmra.mxu0 %vm423_vm1, %v3392_v23 }
  0x45   : > { %657 = vmatprep.mubr.f32.mxu0 %v3171_v0 }
  0x46   : > { %2865 = vmatmul.mubr.msk.f32.gmra.mxu1 %vm423_vm1, %v3392_v23 }
  0x47   : > { %818 = vmatprep.mubr.f32.mxu1 %v3171_v0 }
  0x48   : > { %2848 = vmatmul.mubr.msk.f32.gmra.mxu0 %vm423_vm1, %v3403_v24 }
  0x49   : > { %663 = vmatprep.mubr.f32.mxu0 %v3171_v0 }
  0x4a   : > { %2866 = vmatmul.mubr.msk.f32.gmra.mxu1 %vm423_vm1, %v3403_v24 }
  0x4b   : > { %824 = vmatprep.mubr.f32.mxu1 %v3171_v0 }
  0x4c   : > { %2849 = vmatmul.mubr.msk.f32.gmra.mxu0 %vm423_vm1, %v3414_v25 }
  0x4d   : > { %669 = vmatprep.mubr.f32.mxu0 %v3171_v0 }
  0x4e   : > { %2867 = vmatmul.mubr.msk.f32.gmra.mxu1 %vm423_vm1, %v3414_v25 }
  0x4f   : > { %830 = vmatprep.mubr.f32.mxu1 %v3171_v0 }
  0x50   : > { %2850 = vmatmul.mubr.msk.f32.gmra.mxu0 %vm423_vm1, %v3425_v26 }
  0x51   : > { %675 = vmatprep.mubr.f32.mxu0 %v3171_v0 }
  0x52   : > { %2868 = vmatmul.mubr.msk.f32.gmra.mxu1 %vm423_vm1, %v3425_v26 }
  0x53   : > { %836 = vmatprep.mubr.f32.mxu1 %v3171_v0 }
  0x54   : > { %2851 = vmatmul.mubr.msk.f32.gmra.mxu0 %vm423_vm1, %v3436_v27 }
  0x55   : > { %681 = vmatprep.mubr.f32.mxu0 %v3171_v0 }
  0x56   : > { %2869 = vmatmul.mubr.msk.f32.gmra.mxu1 %vm423_vm1, %v3436_v27 }
  0x57   : > { %842 = vmatprep.mubr.f32.mxu1 %v3171_v0 }
  0x58   : > { %2852 = vmatmul.mubr.msk.f32.gmra.mxu0 %vm423_vm1, %v3447_v28 }
  0x59   : > { %687 = vmatprep.mubr.f32.mxu0 %v3171_v0 }
  0x5a   : > { %2870 = vmatmul.mubr.msk.f32.gmra.mxu1 %vm423_vm1, %v3447_v28 }
  0x5b   : > { %848 = vmatprep.mubr.f32.mxu1 %v3171_v0 }
  0x5c   : > { %2853 = vmatmul.mubr.msk.f32.gmra.mxu0 %vm423_vm1, %v3458_v29 }
  0x5d   : > { %919 = vmatprep.mubr.f32.mxu0 %v3171_v0 }
  0x5e   : > { %2871 = vmatmul.mubr.msk.f32.gmra.mxu1 %vm423_vm1, %v3458_v29 }
  0x5f   : > { %1080 = vmatprep.mubr.f32.mxu1 %v3171_v0 }
  0x60   : > { %2874 = vmatmul.mubr.msk.f32.vlgmr.msra.gmra.mxu0 %vm423_vm1, %v3276_v9 }
  0x61   : > { %2909 = vmatpush1.msk.msra.mxu0 %vm472_vm0, %v3279_v10  ;;  %925 = vmatprep.mubr.f32.mxu0 %v3171_v0 }
  0x62   : > { %2892 = vmatmul.mubr.msk.f32.vlgmr.msra.gmra.mxu1 %vm423_vm1, %v3276_v9  ;;  %2944 = vmatprep.subr.msk.mxu0 %vm472_vm0, %v370_v32 }
  0x63   : > { %2927 = vmatpush1.msk.msra.mxu1 %vm472_vm0, %v3284_v12  ;;  %1086 = vmatprep.mubr.f32.mxu1 %v3171_v0 }
  0x64   : > { %2875 = vmatmul.mubr.msk.f32.gmra.mxu0 %vm423_vm1, %v3298_v14  ;;  %2962 = vmatprep.subr.msk.mxu1 %vm472_vm0, %v371_v33 }
  0x65   : > { %931 = vmatprep.mubr.f32.mxu0 %v3171_v0 }
  0x66   : > { %2893 = vmatmul.mubr.msk.f32.gmra.mxu1 %vm423_vm1, %v3298_v14 }
  0x67   : > { %1092 = vmatprep.mubr.f32.mxu1 %v3171_v0 }
  0x68   : > { %2876 = vmatmul.mubr.msk.f32.gmra.mxu0 %vm423_vm1, %v3314_v16 }
  0x69   : > { %937 = vmatprep.mubr.f32.mxu0 %v3171_v0 }
  0x6a   : > { %2894 = vmatmul.mubr.msk.f32.gmra.mxu1 %vm423_vm1, %v3314_v16 }
  0x6b   : > { %1098 = vmatprep.mubr.f32.mxu1 %v3171_v0 }
  0x6c   : > { %2877 = vmatmul.mubr.msk.f32.gmra.mxu0 %vm423_vm1, %v3326_v17 }
  0x6d   : > { %943 = vmatprep.mubr.f32.mxu0 %v3171_v0 }
  0x6e   : > { %2895 = vmatmul.mubr.msk.f32.gmra.mxu1 %vm423_vm1, %v3326_v17 }
  0x6f   : > { %1104 = vmatprep.mubr.f32.mxu1 %v3171_v0 }
  0x70   : > { %2878 = vmatmul.mubr.msk.f32.gmra.mxu0 %vm423_vm1, %v3337_v18 }
  0x71   : > { %949 = vmatprep.mubr.f32.mxu0 %v3171_v0 }
  0x72   : > { %2896 = vmatmul.mubr.msk.f32.gmra.mxu1 %vm423_vm1, %v3337_v18 }
  0x73   : > { %1110 = vmatprep.mubr.f32.mxu1 %v3171_v0 }
  0x74   : > { %2879 = vmatmul.mubr.msk.f32.gmra.mxu0 %vm423_vm1, %v3348_v19 }
  0x75   : > { %955 = vmatprep.mubr.f32.mxu0 %v3171_v0 }
  0x76   : > { %2897 = vmatmul.mubr.msk.f32.gmra.mxu1 %vm423_vm1, %v3348_v19 }
  0x77   : > { %1116 = vmatprep.mubr.f32.mxu1 %v3171_v0 }
  0x78   : > { %2880 = vmatmul.mubr.msk.f32.gmra.mxu0 %vm423_vm1, %v3359_v20 }
  0x79   : > { %961 = vmatprep.mubr.f32.mxu0 %v3171_v0 }
  0x7a   : > { %2898 = vmatmul.mubr.msk.f32.gmra.mxu1 %vm423_vm1, %v3359_v20 }
  0x7b   : > { %1122 = vmatprep.mubr.f32.mxu1 %v3171_v0 }
  0x7c   : > { %2881 = vmatmul.mubr.msk.f32.gmra.mxu0 %vm423_vm1, %v3370_v21 }
  0x7d   : > { %967 = vmatprep.mubr.f32.mxu0 %v3171_v0 }
  0x7e   : > { %2899 = vmatmul.mubr.msk.f32.gmra.mxu1 %vm423_vm1, %v3370_v21 }
  0x7f   : > { %1128 = vmatprep.mubr.f32.mxu1 %v3171_v0 }
  0x80   : > { %2882 = vmatmul.mubr.msk.f32.gmra.mxu0 %vm423_vm1, %v3381_v22 }
  0x81   : > { %973 = vmatprep.mubr.f32.mxu0 %v3171_v0 }
  0x82   : > { %2900 = vmatmul.mubr.msk.f32.gmra.mxu1 %vm423_vm1, %v3381_v22 }
  0x83   : > { %1134 = vmatprep.mubr.f32.mxu1 %v3171_v0 }
  0x84   : > { %2883 = vmatmul.mubr.msk.f32.gmra.mxu0 %vm423_vm1, %v3392_v23 }
  0x85   : > { %979 = vmatprep.mubr.f32.mxu0 %v3171_v0 }
  0x86   : > { %2901 = vmatmul.mubr.msk.f32.gmra.mxu1 %vm423_vm1, %v3392_v23 }
  0x87   : > { %1140 = vmatprep.mubr.f32.mxu1 %v3171_v0 }
  0x88   : > { %2884 = vmatmul.mubr.msk.f32.gmra.mxu0 %vm423_vm1, %v3403_v24 }
  0x89   : > { %985 = vmatprep.mubr.f32.mxu0 %v3171_v0 }
  0x8a   : > { %2902 = vmatmul.mubr.msk.f32.gmra.mxu1 %vm423_vm1, %v3403_v24 }
  0x8b   : > { %1146 = vmatprep.mubr.f32.mxu1 %v3171_v0 }
  0x8c   : > { %2885 = vmatmul.mubr.msk.f32.gmra.mxu0 %vm423_vm1, %v3414_v25 }
  0x8d   : > { %991 = vmatprep.mubr.f32.mxu0 %v3171_v0 }
  0x8e   : > { %2903 = vmatmul.mubr.msk.f32.gmra.mxu1 %vm423_vm1, %v3414_v25 }
  0x8f   : > { %1152 = vmatprep.mubr.f32.mxu1 %v3171_v0 }
  0x90   : > { %2886 = vmatmul.mubr.msk.f32.gmra.mxu0 %vm423_vm1, %v3425_v26 }
  0x91   : > { %997 = vmatprep.mubr.f32.mxu0 %v3171_v0 }
  0x92   : > { %2904 = vmatmul.mubr.msk.f32.gmra.mxu1 %vm423_vm1, %v3425_v26 }
  0x93   : > { %1158 = vmatprep.mubr.f32.mxu1 %v3171_v0 }
  0x94   : > { %2887 = vmatmul.mubr.msk.f32.gmra.mxu0 %vm423_vm1, %v3436_v27 }
  0x95   : > { %1003 = vmatprep.mubr.f32.mxu0 %v3171_v0 }
  0x96   : > { %2905 = vmatmul.mubr.msk.f32.gmra.mxu1 %vm423_vm1, %v3436_v27 }
  0x97   : > { %1164 = vmatprep.mubr.f32.mxu1 %v3171_v0  ;;  %v346_v41 = vpop.permute.xlu0 %345 }
  0x98   : > { %2888 = vmatmul.mubr.msk.f32.gmra.mxu0 %vm423_vm1, %v3447_v28  ;;  %v354_v42 = vrot.slane %v346_v41, %v353_v39 }
  0x99   : > { %1009 = vmatprep.mubr.f32.mxu0 %v3171_v0 }
  0x9a   : > { %2906 = vmatmul.mubr.msk.f32.gmra.mxu1 %vm423_vm1, %v3447_v28  ;;  %v385_v46 = vcombine.high %v354_v42, %v354_v42 }
  0x9b   : > { %1170 = vmatprep.mubr.f32.mxu1 %v3171_v0 }
  0x9c   : > { %2889 = vmatmul.mubr.msk.f32.gmra.mxu0 %vm423_vm1, %v3458_v29  ;;  %v406_v49 = vsel %vm342_vm2, %v373_v47, %v385_v46 }
  0x9d   : > { %1241 = vmatprep.mubr.f32.mxu0 %v3171_v0 }
  0x9e   : > { %2907 = vmatmul.mubr.msk.f32.gmra.mxu1 %vm423_vm1, %v3458_v29 }
  0x9f   : > { %1402 = vmatprep.mubr.f32.mxu1 %v3171_v0 }
  0xa0   : > { %2910 = vmatmul.mubr.msk.f32.vlgmr.msra.gmra.mxu0 %vm423_vm1, %v3276_v9 }
  0xa1   : > { %2945 = vmatpush1.msk.msra.mxu0 %vm472_vm0, %v3464_v30  ;;  %1247 = vmatprep.mubr.f32.mxu0 %v3171_v0 }
  0xa2   : > { %2928 = vmatmul.mubr.msk.f32.vlgmr.msra.gmra.mxu1 %vm423_vm1, %v3276_v9  ;;  %2980 = vmatprep.subr.msk.mxu0 %vm472_vm0, %v372_v48 }
  0xa3   : > { %2963 = vmatpush1.msk.msra.mxu1 %vm472_vm0, %v3470_v31  ;;  %1408 = vmatprep.mubr.f32.mxu1 %v3171_v0 }
  0xa4   : > { %2911 = vmatmul.mubr.msk.f32.gmra.mxu0 %vm423_vm1, %v3298_v14  ;;  %2998 = vmatprep.subr.msk.mxu1 %vm472_vm0, %v406_v49 }
  0xa5   : > { %1253 = vmatprep.mubr.f32.mxu0 %v3171_v0 }
  0xa6   : > { %2929 = vmatmul.mubr.msk.f32.gmra.mxu1 %vm423_vm1, %v3298_v14 }
  0xa7   : > { %1414 = vmatprep.mubr.f32.mxu1 %v3171_v0 }
  0xa8   : > { %2912 = vmatmul.mubr.msk.f32.gmra.mxu0 %vm423_vm1, %v3314_v16 }
  0xa9   : > { %1259 = vmatprep.mubr.f32.mxu0 %v3171_v0 }
  0xaa   : > { %2930 = vmatmul.mubr.msk.f32.gmra.mxu1 %vm423_vm1, %v3314_v16 }
  0xab   : > { %1420 = vmatprep.mubr.f32.mxu1 %v3171_v0 }
  0xac   : > { %2913 = vmatmul.mubr.msk.f32.gmra.mxu0 %vm423_vm1, %v3326_v17 }
  0xad   : > { %1265 = vmatprep.mubr.f32.mxu0 %v3171_v0 }
  0xae   : > { %2931 = vmatmul.mubr.msk.f32.gmra.mxu1 %vm423_vm1, %v3326_v17 }
  0xaf   : > { %1426 = vmatprep.mubr.f32.mxu1 %v3171_v0 }
  0xb0   : > { %2914 = vmatmul.mubr.msk.f32.gmra.mxu0 %vm423_vm1, %v3337_v18 }
  0xb1   : > { %1271 = vmatprep.mubr.f32.mxu0 %v3171_v0 }
  0xb2   : > { %2932 = vmatmul.mubr.msk.f32.gmra.mxu1 %vm423_vm1, %v3337_v18 }
  0xb3   : > { %1432 = vmatprep.mubr.f32.mxu1 %v3171_v0 }
  0xb4   : > { %2915 = vmatmul.mubr.msk.f32.gmra.mxu0 %vm423_vm1, %v3348_v19 }
  0xb5   : > { %1277 = vmatprep.mubr.f32.mxu0 %v3171_v0 }
  0xb6   : > { %2933 = vmatmul.mubr.msk.f32.gmra.mxu1 %vm423_vm1, %v3348_v19 }
  0xb7   : > { %1438 = vmatprep.mubr.f32.mxu1 %v3171_v0 }
  0xb8   : > { %2916 = vmatmul.mubr.msk.f32.gmra.mxu0 %vm423_vm1, %v3359_v20 }
  0xb9   : > { %1283 = vmatprep.mubr.f32.mxu0 %v3171_v0 }
  0xba   : > { %2934 = vmatmul.mubr.msk.f32.gmra.mxu1 %vm423_vm1, %v3359_v20 }
  0xbb   : > { %1444 = vmatprep.mubr.f32.mxu1 %v3171_v0 }
  0xbc   : > { %2917 = vmatmul.mubr.msk.f32.gmra.mxu0 %vm423_vm1, %v3370_v21 }
  0xbd   : > { %1289 = vmatprep.mubr.f32.mxu0 %v3171_v0 }
  0xbe   : > { %2935 = vmatmul.mubr.msk.f32.gmra.mxu1 %vm423_vm1, %v3370_v21 }
  0xbf   : > { %1450 = vmatprep.mubr.f32.mxu1 %v3171_v0 }
  0xc0   : > { %2918 = vmatmul.mubr.msk.f32.gmra.mxu0 %vm423_vm1, %v3381_v22 }
  0xc1   : > { %1295 = vmatprep.mubr.f32.mxu0 %v3171_v0 }
  0xc2   : > { %2936 = vmatmul.mubr.msk.f32.gmra.mxu1 %vm423_vm1, %v3381_v22 }
  0xc3   : > { %1456 = vmatprep.mubr.f32.mxu1 %v3171_v0 }
  0xc4   : > { %2919 = vmatmul.mubr.msk.f32.gmra.mxu0 %vm423_vm1, %v3392_v23 }
  0xc5   : > { %1301 = vmatprep.mubr.f32.mxu0 %v3171_v0 }
  0xc6   : > { %2937 = vmatmul.mubr.msk.f32.gmra.mxu1 %vm423_vm1, %v3392_v23 }
  0xc7   : > { %1462 = vmatprep.mubr.f32.mxu1 %v3171_v0 }
  0xc8   : > { %2920 = vmatmul.mubr.msk.f32.gmra.mxu0 %vm423_vm1, %v3403_v24 }
  0xc9   : > { %1307 = vmatprep.mubr.f32.mxu0 %v3171_v0 }
  0xca   : > { %2938 = vmatmul.mubr.msk.f32.gmra.mxu1 %vm423_vm1, %v3403_v24 }
  0xcb   : > { %1468 = vmatprep.mubr.f32.mxu1 %v3171_v0 }
  0xcc   : > { %2921 = vmatmul.mubr.msk.f32.gmra.mxu0 %vm423_vm1, %v3414_v25 }
  0xcd   : > { %1313 = vmatprep.mubr.f32.mxu0 %v3171_v0 }
  0xce   : > { %2939 = vmatmul.mubr.msk.f32.gmra.mxu1 %vm423_vm1, %v3414_v25 }
  0xcf   : > { %1474 = vmatprep.mubr.f32.mxu1 %v3171_v0 }
  0xd0   : > { %2922 = vmatmul.mubr.msk.f32.gmra.mxu0 %vm423_vm1, %v3425_v26 }
  0xd1   : > { %1319 = vmatprep.mubr.f32.mxu0 %v3171_v0 }
  0xd2   : > { %2940 = vmatmul.mubr.msk.f32.gmra.mxu1 %vm423_vm1, %v3425_v26 }
  0xd3   : > { %1480 = vmatprep.mubr.f32.mxu1 %v3171_v0 }
  0xd4   : > { %2923 = vmatmul.mubr.msk.f32.gmra.mxu0 %vm423_vm1, %v3436_v27 }
  0xd5   : > { %1325 = vmatprep.mubr.f32.mxu0 %v3171_v0 }
  0xd6   : > { %2941 = vmatmul.mubr.msk.f32.gmra.mxu1 %vm423_vm1, %v3436_v27 }
  0xd7   : > { %1486 = vmatprep.mubr.f32.mxu1 %v3171_v0 }
  0xd8   : > { %2924 = vmatmul.mubr.msk.f32.gmra.mxu0 %vm423_vm1, %v3447_v28 }
  0xd9   : > { %1331 = vmatprep.mubr.f32.mxu0 %v3171_v0 }
  0xda   : > { %2942 = vmatmul.mubr.msk.f32.gmra.mxu1 %vm423_vm1, %v3447_v28 }
  0xdb   : > { %1492 = vmatprep.mubr.f32.mxu1 %v3171_v0 }
  0xdc   : > { %2925 = vmatmul.mubr.msk.f32.gmra.mxu0 %vm423_vm1, %v3458_v29 }
  0xdd   : > { %1563 = vmatprep.mubr.f32.mxu0 %v3171_v0 }
  0xde   : > { %2943 = vmatmul.mubr.msk.f32.gmra.mxu1 %vm423_vm1, %v3458_v29 }
  0xdf   : > { %1724 = vmatprep.mubr.f32.mxu1 %v3171_v0 }
  0xe0   : > { %v599_v50 = vpop.f32.mrf.mxu0  ;;  %2946 = vmatmul.mubr.msk.f32.vlgmr.msra.gmra.mxu0 %vm423_vm1, %v3276_v9 }
  0xe1   : > { %2981 = vmatpush1.msk.msra.mxu0 %vm472_vm0, %v3579_v45  ;;  %1569 = vmatprep.mubr.f32.mxu0 %v3171_v0 }
  0xe2   : > { %v601_v51 = vpop.f32.mrf.mxu0  ;;  %v760_v52 = vpop.f32.mrf.mxu1  ;;  %2964 = vmatmul.mubr.msk.f32.vlgmr.msra.gmra.mxu1 %vm423_vm1, %v3276_v9 }
  0xe3   : > { %v2175_v53 = vmax.f32 %v599_v50, %v601_v51  ;;  %2999 = vmatpush1.msk.msra.mxu1 %vm472_vm0, %v3575_v43  ;;  %1730 = vmatprep.mubr.f32.mxu1 %v3171_v0 }
  0xe4   : > { %v605_v54 = vpop.f32.mrf.mxu0  ;;  %2947 = vmatmul.mubr.msk.f32.gmra.mxu0 %vm423_vm1, %v3298_v14  ;;  %v3705_v55 = vpop.f32.mrf.mxu1 }
  0xe5   : > { %v3707_v56 = vmax.f32 %v2175_v53, %v760_v52  ;;  %1575 = vmatprep.mubr.f32.mxu0 %v3171_v0 }
  0xe6   : > { %v607_v57 = vpop.f32.mrf.mxu0  ;;  %v766_v58 = vpop.f32.mrf.mxu1  ;;  %2965 = vmatmul.mubr.msk.f32.gmra.mxu1 %vm423_vm1, %v3298_v14 }
  0xe7   : > { %v2207_v59 = vmax.f32 %v3707_v56, %v3705_v55  ;;  %v2176_v60 = vmax.f32 %v605_v54, %v607_v57  ;;  %1736 = vmatprep.mubr.f32.mxu1 %v3171_v0 }
  0xe8   : > { %v611_v61 = vpop.f32.mrf.mxu0  ;;  %2948 = vmatmul.mubr.msk.f32.gmra.mxu0 %vm423_vm1, %v3314_v16  ;;  %v3717_v62 = vpop.f32.mrf.mxu1 }
  0xe9   : > { %v3719_v63 = vmax.f32 %v2176_v60, %v766_v58  ;;  %1581 = vmatprep.mubr.f32.mxu0 %v3171_v0 }
  0xea   : > { %v613_v1 = vpop.f32.mrf.mxu0  ;;  %v772_v2 = vpop.f32.mrf.mxu1  ;;  %2966 = vmatmul.mubr.msk.f32.gmra.mxu1 %vm423_vm1, %v3314_v16 }
  0xeb   : > { %v2208_v3 = vmax.f32 %v3719_v63, %v3717_v62  ;;  %v2177_v4 = vmax.f32 %v611_v61, %v613_v1  ;;  %1742 = vmatprep.mubr.f32.mxu1 %v3171_v0 }
  0xec   : > { %v617_v5 = vpop.f32.mrf.mxu0  ;;  %2949 = vmatmul.mubr.msk.f32.gmra.mxu0 %vm423_vm1, %v3326_v17  ;;  %v3729_v6 = vpop.f32.mrf.mxu1 }
  0xed   : > { %v3731_v7 = vmax.f32 %v2177_v4, %v772_v2  ;;  %1587 = vmatprep.mubr.f32.mxu0 %v3171_v0 }
  0xee   : > { %v619_v8 = vpop.f32.mrf.mxu0  ;;  %v778_v10 = vpop.f32.mrf.mxu1  ;;  %2967 = vmatmul.mubr.msk.f32.gmra.mxu1 %vm423_vm1, %v3326_v17 }
  0xef   : > { %v2209_v11 = vmax.f32 %v3731_v7, %v3729_v6  ;;  %v2178_v12 = vmax.f32 %v617_v5, %v619_v8  ;;  %1748 = vmatprep.mubr.f32.mxu1 %v3171_v0 }
  0xf0   : > { %v623_v13 = vpop.f32.mrf.mxu0  ;;  %2950 = vmatmul.mubr.msk.f32.gmra.mxu0 %vm423_vm1, %v3337_v18  ;;  %v3741_v15 = vpop.f32.mrf.mxu1 }
  0xf1   : > { %v3743_v30 = vmax.f32 %v2178_v12, %v778_v10  ;;  %1593 = vmatprep.mubr.f32.mxu0 %v3171_v0 }
  0xf2   : > { %v625_v31 = vpop.f32.mrf.mxu0  ;;  %v784_v32 = vpop.f32.mrf.mxu1  ;;  %2968 = vmatmul.mubr.msk.f32.gmra.mxu1 %vm423_vm1, %v3337_v18 }
  0xf3   : > { %v2210_v33 = vmax.f32 %v3743_v30, %v3741_v15  ;;  %v2179_v34 = vmax.f32 %v623_v13, %v625_v31  ;;  %1754 = vmatprep.mubr.f32.mxu1 %v3171_v0 }
  0xf4   : > { %v629_v35 = vpop.f32.mrf.mxu0  ;;  %2951 = vmatmul.mubr.msk.f32.gmra.mxu0 %vm423_vm1, %v3348_v19  ;;  %v3753_v36 = vpop.f32.mrf.mxu1 }
  0xf5   : > { %v3755_v37 = vmax.f32 %v2179_v34, %v784_v32  ;;  %1599 = vmatprep.mubr.f32.mxu0 %v3171_v0 }
  0xf6   : > { %v631_v38 = vpop.f32.mrf.mxu0  ;;  %v790_v39 = vpop.f32.mrf.mxu1  ;;  %2969 = vmatmul.mubr.msk.f32.gmra.mxu1 %vm423_vm1, %v3348_v19 }
  0xf7   : > { %v2211_v40 = vmax.f32 %v3755_v37, %v3753_v36  ;;  %v2180_v41 = vmax.f32 %v629_v35, %v631_v38  ;;  %1760 = vmatprep.mubr.f32.mxu1 %v3171_v0 }
  0xf8   : > { %v635_v42 = vpop.f32.mrf.mxu0  ;;  %2952 = vmatmul.mubr.msk.f32.gmra.mxu0 %vm423_vm1, %v3359_v20  ;;  %v3765_v43 = vpop.f32.mrf.mxu1 }
  0xf9   : > { %v3767_v44 = vmax.f32 %v2180_v41, %v790_v39  ;;  %1605 = vmatprep.mubr.f32.mxu0 %v3171_v0 }
  0xfa   : > { %v637_v45 = vpop.f32.mrf.mxu0  ;;  %v796_v46 = vpop.f32.mrf.mxu1  ;;  %2970 = vmatmul.mubr.msk.f32.gmra.mxu1 %vm423_vm1, %v3359_v20 }
  0xfb   : > { %v2212_v47 = vmax.f32 %v3767_v44, %v3765_v43  ;;  %v2181_v48 = vmax.f32 %v635_v42, %v637_v45  ;;  %1766 = vmatprep.mubr.f32.mxu1 %v3171_v0 }
  0xfc   : > { %v641_v49 = vpop.f32.mrf.mxu0  ;;  %2953 = vmatmul.mubr.msk.f32.gmra.mxu0 %vm423_vm1, %v3370_v21  ;;  %v3777_v50 = vpop.f32.mrf.mxu1 }
  0xfd   : > { %v3779_v51 = vmax.f32 %v2181_v48, %v796_v46  ;;  %1611 = vmatprep.mubr.f32.mxu0 %v3171_v0 }
  0xfe   : > { %v643_v52 = vpop.f32.mrf.mxu0  ;;  %v802_v53 = vpop.f32.mrf.mxu1  ;;  %2971 = vmatmul.mubr.msk.f32.gmra.mxu1 %vm423_vm1, %v3370_v21 }
  0xff   : > { %v2213_v54 = vmax.f32 %v3779_v51, %v3777_v50  ;;  %v2182_v57 = vmax.f32 %v641_v49, %v643_v52  ;;  %1772 = vmatprep.mubr.f32.mxu1 %v3171_v0 }
 0x100   : > { %v647_v58 = vpop.f32.mrf.mxu0  ;;  %2954 = vmatmul.mubr.msk.f32.gmra.mxu0 %vm423_vm1, %v3381_v22  ;;  %v3789_v60 = vpop.f32.mrf.mxu1 }
 0x101   : > { %v3791_v61 = vmax.f32 %v2182_v57, %v802_v53  ;;  %1617 = vmatprep.mubr.f32.mxu0 %v3171_v0 }
 0x102   : > { %v649_v1 = vpop.f32.mrf.mxu0  ;;  %v808_v2 = vpop.f32.mrf.mxu1  ;;  %2972 = vmatmul.mubr.msk.f32.gmra.mxu1 %vm423_vm1, %v3381_v22 }
 0x103   : > { %v2214_v4 = vmax.f32 %v3791_v61, %v3789_v60  ;;  %v2183_v5 = vmax.f32 %v647_v58, %v649_v1  ;;  %1778 = vmatprep.mubr.f32.mxu1 %v3171_v0 }
 0x104   : > { %v653_v8 = vpop.f32.mrf.mxu0  ;;  %2955 = vmatmul.mubr.msk.f32.gmra.mxu0 %vm423_vm1, %v3392_v23  ;;  %v3801_v10 = vpop.f32.mrf.mxu1 }
 0x105   : > { %v3803_v12 = vmax.f32 %v2183_v5, %v808_v2  ;;  %1623 = vmatprep.mubr.f32.mxu0 %v3171_v0 }
 0x106   : > { %v655_v13 = vpop.f32.mrf.mxu0  ;;  %v814_v31 = vpop.f32.mrf.mxu1  ;;  %2973 = vmatmul.mubr.msk.f32.gmra.mxu1 %vm423_vm1, %v3392_v23 }
 0x107   : > { %v2184_v34 = vmax.f32 %v653_v8, %v655_v13  ;;  %1784 = vmatprep.mubr.f32.mxu1 %v3171_v0  ;;  %v4671_v61 = vmax.f32 %v3803_v12, %v3801_v10 }
 0x108   : > { %v659_v35 = vpop.f32.mrf.mxu0  ;;  %2956 = vmatmul.mubr.msk.f32.gmra.mxu0 %vm423_vm1, %v3403_v24  ;;  %v3813_v38 = vpop.f32.mrf.mxu1 }
 0x109   : > { %v3815_v39 = vmax.f32 %v2184_v34, %v814_v31  ;;  %1629 = vmatprep.mubr.f32.mxu0 %v3171_v0 }
 0x10a   : > { %v661_v41 = vpop.f32.mrf.mxu0  ;;  %v820_v42 = vpop.f32.mrf.mxu1  ;;  %2974 = vmatmul.mubr.msk.f32.gmra.mxu1 %vm423_vm1, %v3403_v24 }
 0x10b   : > { %v2185_v46 = vmax.f32 %v659_v35, %v661_v41  ;;  %1790 = vmatprep.mubr.f32.mxu1 %v3171_v0  ;;  %v4672_v12 = vmax.f32 %v3815_v39, %v3813_v38 }
 0x10c   : > { %v665_v48 = vpop.f32.mrf.mxu0  ;;  %2957 = vmatmul.mubr.msk.f32.gmra.mxu0 %vm423_vm1, %v3414_v25  ;;  %v3825_v49 = vpop.f32.mrf.mxu1 }
 0x10d   : > { %v3827_v52 = vmax.f32 %v2185_v46, %v820_v42  ;;  %1635 = vmatprep.mubr.f32.mxu0 %v3171_v0 }
 0x10e   : > { %v667_v53 = vpop.f32.mrf.mxu0  ;;  %v826_v57 = vpop.f32.mrf.mxu1  ;;  %2975 = vmatmul.mubr.msk.f32.gmra.mxu1 %vm423_vm1, %v3414_v25 }
 0x10f   : > { %v2186_v1 = vmax.f32 %v665_v48, %v667_v53  ;;  %1796 = vmatprep.mubr.f32.mxu1 %v3171_v0  ;;  %v4673_v39 = vmax.f32 %v3827_v52, %v3825_v49 }
 0x110   : > { %v671_v2 = vpop.f32.mrf.mxu0  ;;  %2958 = vmatmul.mubr.msk.f32.gmra.mxu0 %vm423_vm1, %v3425_v26  ;;  %v3837_v5 = vpop.f32.mrf.mxu1 }
 0x111   : > { %v3839_v8 = vmax.f32 %v2186_v1, %v826_v57  ;;  %1641 = vmatprep.mubr.f32.mxu0 %v3171_v0 }
 0x112   : > { %v673_v13 = vpop.f32.mrf.mxu0  ;;  %v832_v31 = vpop.f32.mrf.mxu1  ;;  %2976 = vmatmul.mubr.msk.f32.gmra.mxu1 %vm423_vm1, %v3425_v26 }
 0x113   : > { %v2187_v35 = vmax.f32 %v671_v2, %v673_v13  ;;  %1802 = vmatprep.mubr.f32.mxu1 %v3171_v0  ;;  %v4674_v52 = vmax.f32 %v3839_v8, %v3837_v5 }
 0x114   : > { %v677_v41 = vpop.f32.mrf.mxu0  ;;  %2959 = vmatmul.mubr.msk.f32.gmra.mxu0 %vm423_vm1, %v3436_v27  ;;  %v3849_v42 = vpop.f32.mrf.mxu1 }
 0x115   : > { %v3851_v46 = vmax.f32 %v2187_v35, %v832_v31  ;;  %1647 = vmatprep.mubr.f32.mxu0 %v3171_v0 }
 0x116   : > { %v679_v48 = vpop.f32.mrf.mxu0  ;;  %v838_v53 = vpop.f32.mrf.mxu1  ;;  %2977 = vmatmul.mubr.msk.f32.gmra.mxu1 %vm423_vm1, %v3436_v27 }
 0x117   : > { %v2188_v1 = vmax.f32 %v677_v41, %v679_v48  ;;  %1808 = vmatprep.mubr.f32.mxu1 %v3171_v0  ;;  %v4675_v8 = vmax.f32 %v3851_v46, %v3849_v42 }
 0x118   : > { %v683_v2 = vpop.f32.mrf.mxu0  ;;  %2960 = vmatmul.mubr.msk.f32.gmra.mxu0 %vm423_vm1, %v3447_v28  ;;  %v3861_v13 = vpop.f32.mrf.mxu1 }
 0x119   : > { %v3863_v31 = vmax.f32 %v2188_v1, %v838_v53  ;;  %1653 = vmatprep.mubr.f32.mxu0 %v3171_v0 }
 0x11a   : > { %v685_v35 = vpop.f32.mrf.mxu0  ;;  %v844_v34 = vpop.f32.mrf.mxu1  ;;  %2978 = vmatmul.mubr.msk.f32.gmra.mxu1 %vm423_vm1, %v3447_v28 }
 0x11b   : > { %v2189_v48 = vmax.f32 %v683_v2, %v685_v35  ;;  %1814 = vmatprep.mubr.f32.mxu1 %v3171_v0  ;;  %v4676_v46 = vmax.f32 %v3863_v31, %v3861_v13  ;;  %v3091_v13 = vld [vmem:[%s4652_s1 + $0x70] sm:$0xff] }
 0x11c   : > { %v689_v57 = vpop.f32.mrf.mxu0  ;;  %2961 = vmatmul.mubr.msk.f32.gmra.mxu0 %vm423_vm1, %v3458_v29  ;;  %v3873_v58 = vpop.f32.mrf.mxu1 }
 0x11d   : > { %v3875_v53 = vmax.f32 %v2189_v48, %v844_v34  ;;  %1885 = vmatprep.mubr.f32.mxu0 %v3171_v0 }
 0x11e   : > { %v691_v1 = vpop.f32.mrf.mxu0  ;;  %v850_v45 = vpop.f32.mrf.mxu1  ;;  %2979 = vmatmul.mubr.msk.f32.gmra.mxu1 %vm423_vm1, %v3458_v29 }
 0x11f   : > { %v2190_v2 = vmax.f32 %v689_v57, %v691_v1  ;;  %2046 = vmatprep.mubr.f32.mxu1 %v3171_v0 }
 0x120   : > { %v921_v35 = vpop.f32.mrf.mxu0  ;;  %2982 = vmatmul.mubr.msk.f32.vlgmr.msra.gmra.mxu0 %vm423_vm1, %v3276_v9  ;;  %v3885_v41 = vpop.f32.mrf.mxu1 }
 0x121   : > { %v3887_v34 = vmax.f32 %v2190_v2, %v850_v45  ;;  %v2223_v48 = vmax.f32 %v2207_v59, %v921_v35  ;;  %1891 = vmatprep.mubr.f32.mxu0 %v3171_v0 }
 0x122   : > { %v923_v29 = vpop.f32.mrf.mxu0  ;;  %v1082_v32 = vpop.f32.mrf.mxu1  ;;  %3000 = vmatmul.mubr.msk.f32.vlgmr.msra.gmra.mxu1 %vm423_vm1, %v3276_v9 }
 0x123   : > { %v2222_v57 = vmax.f32 %v3887_v34, %v3885_v41  ;;  %v2239_v1 = vmax.f32 %v2223_v48, %v923_v29  ;;  %2052 = vmatprep.mubr.f32.mxu1 %v3171_v0 }
 0x124   : > { %v927_v28 = vpop.f32.mrf.mxu0  ;;  %2983 = vmatmul.mubr.msk.f32.gmra.mxu0 %vm423_vm1, %v3298_v14  ;;  %v3900_v45 = vpop.f32.mrf.mxu1 }
 0x125   : > { %v3902_v55 = vmax.f32 %v2239_v1, %v1082_v32  ;;  %v2224_v56 = vmax.f32 %v2208_v3, %v927_v28  ;;  %1897 = vmatprep.mubr.f32.mxu0 %v3171_v0 }
 0x126   : > { %v929_v9 = vpop.f32.mrf.mxu0  ;;  %v1088_v59 = vpop.f32.mrf.mxu1  ;;  %3001 = vmatmul.mubr.msk.f32.gmra.mxu1 %vm423_vm1, %v3298_v14 }
 0x127   : > { %v2271_v2 = vmax.f32 %v3902_v55, %v3900_v45  ;;  %v2240_v35 = vmax.f32 %v2224_v56, %v929_v9  ;;  %2058 = vmatprep.mubr.f32.mxu1 %v3171_v0 }
 0x128   : > { %v933_v48 = vpop.f32.mrf.mxu0  ;;  %2984 = vmatmul.mubr.msk.f32.gmra.mxu0 %vm423_vm1, %v3314_v16  ;;  %v3915_v32 = vpop.f32.mrf.mxu1 }
 0x129   : > { %v3917_v62 = vmax.f32 %v2240_v35, %v1088_v59  ;;  %v2225_v63 = vmax.f32 %v2209_v11, %v933_v48  ;;  %1903 = vmatprep.mubr.f32.mxu0 %v3171_v0 }
 0x12a   : > { %v935_v14 = vpop.f32.mrf.mxu0  ;;  %v1094_v3 = vpop.f32.mrf.mxu1  ;;  %3002 = vmatmul.mubr.msk.f32.gmra.mxu1 %vm423_vm1, %v3314_v16 }
 0x12b   : > { %v2272_v28 = vmax.f32 %v3917_v62, %v3915_v32  ;;  %v2241_v29 = vmax.f32 %v2225_v63, %v935_v14  ;;  %2064 = vmatprep.mubr.f32.mxu1 %v3171_v0 }
 0x12c   : > { %v939_v1 = vpop.f32.mrf.mxu0  ;;  %2985 = vmatmul.mubr.msk.f32.gmra.mxu0 %vm423_vm1, %v3326_v17  ;;  %v3930_v56 = vpop.f32.mrf.mxu1 }
 0x12d   : > { %v3932_v6 = vmax.f32 %v2241_v29, %v1094_v3  ;;  %v2226_v7 = vmax.f32 %v2210_v33, %v939_v1  ;;  %1909 = vmatprep.mubr.f32.mxu0 %v3171_v0 }
 0x12e   : > { %v941_v16 = vpop.f32.mrf.mxu0  ;;  %v1100_v11 = vpop.f32.mrf.mxu1  ;;  %3003 = vmatmul.mubr.msk.f32.gmra.mxu1 %vm423_vm1, %v3326_v17 }
 0x12f   : > { %v2273_v9 = vmax.f32 %v3932_v6, %v3930_v56  ;;  %v2242_v59 = vmax.f32 %v2226_v7, %v941_v16  ;;  %2070 = vmatprep.mubr.f32.mxu1 %v3171_v0 }
 0x130   : > { %v945_v35 = vpop.f32.mrf.mxu0  ;;  %2986 = vmatmul.mubr.msk.f32.gmra.mxu0 %vm423_vm1, %v3337_v18  ;;  %v3945_v48 = vpop.f32.mrf.mxu1 }
 0x131   : > { %v3947_v15 = vmax.f32 %v2242_v59, %v1100_v11  ;;  %v2227_v30 = vmax.f32 %v2211_v40, %v945_v35  ;;  %1915 = vmatprep.mubr.f32.mxu0 %v3171_v0 }
 0x132   : > { %v947_v17 = vpop.f32.mrf.mxu0  ;;  %v1106_v33 = vpop.f32.mrf.mxu1  ;;  %3004 = vmatmul.mubr.msk.f32.gmra.mxu1 %vm423_vm1, %v3337_v18 }
 0x133   : > { %v2274_v63 = vmax.f32 %v3947_v15, %v3945_v48  ;;  %v2243_v14 = vmax.f32 %v2227_v30, %v947_v17  ;;  %2076 = vmatprep.mubr.f32.mxu1 %v3171_v0 }
 0x134   : > { %v951_v3 = vpop.f32.mrf.mxu0  ;;  %2987 = vmatmul.mubr.msk.f32.gmra.mxu0 %vm423_vm1, %v3348_v19  ;;  %v3960_v29 = vpop.f32.mrf.mxu1 }
 0x135   : > { %v3962_v36 = vmax.f32 %v2243_v14, %v1106_v33  ;;  %v2228_v37 = vmax.f32 %v2212_v47, %v951_v3  ;;  %1921 = vmatprep.mubr.f32.mxu0 %v3171_v0 }
 0x136   : > { %v953_v18 = vpop.f32.mrf.mxu0  ;;  %v1112_v40 = vpop.f32.mrf.mxu1  ;;  %3005 = vmatmul.mubr.msk.f32.gmra.mxu1 %vm423_vm1, %v3348_v19 }
 0x137   : > { %v2275_v1 = vmax.f32 %v3962_v36, %v3960_v29  ;;  %v2244_v7 = vmax.f32 %v2228_v37, %v953_v18  ;;  %2082 = vmatprep.mubr.f32.mxu1 %v3171_v0 }
 0x138   : > { %v957_v16 = vpop.f32.mrf.mxu0  ;;  %2988 = vmatmul.mubr.msk.f32.gmra.mxu0 %vm423_vm1, %v3359_v20  ;;  %v3975_v11 = vpop.f32.mrf.mxu1 }
 0x139   : > { %v3977_v43 = vmax.f32 %v2244_v7, %v1112_v40  ;;  %v2229_v44 = vmax.f32 %v2213_v54, %v957_v16  ;;  %1927 = vmatprep.mubr.f32.mxu0 %v3171_v0 }
 0x13a   : > { %v959_v19 = vpop.f32.mrf.mxu0  ;;  %v1118_v47 = vpop.f32.mrf.mxu1  ;;  %3006 = vmatmul.mubr.msk.f32.gmra.mxu1 %vm423_vm1, %v3359_v20 }
 0x13b   : > { %v2276_v59 = vmax.f32 %v3977_v43, %v3975_v11  ;;  %v2245_v35 = vmax.f32 %v2229_v44, %v959_v19  ;;  %2088 = vmatprep.mubr.f32.mxu1 %v3171_v0 }
 0x13c   : > { %v963_v30 = vpop.f32.mrf.mxu0  ;;  %2989 = vmatmul.mubr.msk.f32.gmra.mxu0 %vm423_vm1, %v3370_v21  ;;  %v3990_v17 = vpop.f32.mrf.mxu1 }
 0x13d   : > { %v3992_v50 = vmax.f32 %v2245_v35, %v1118_v47  ;;  %v2230_v51 = vmax.f32 %v2214_v4, %v963_v30  ;;  %1933 = vmatprep.mubr.f32.mxu0 %v3171_v0 }
 0x13e   : > { %v965_v20 = vpop.f32.mrf.mxu0  ;;  %v1124_v54 = vpop.f32.mrf.mxu1  ;;  %3007 = vmatmul.mubr.msk.f32.gmra.mxu1 %vm423_vm1, %v3370_v21 }
 0x13f   : > { %v2277_v33 = vmax.f32 %v3992_v50, %v3990_v17  ;;  %v2246_v14 = vmax.f32 %v2230_v51, %v965_v20  ;;  %2094 = vmatprep.mubr.f32.mxu1 %v3171_v0 }
 0x140   : > { %v969_v3 = vpop.f32.mrf.mxu0  ;;  %2990 = vmatmul.mubr.msk.f32.gmra.mxu0 %vm423_vm1, %v3381_v22  ;;  %v4005_v37 = vpop.f32.mrf.mxu1 }
 0x141   : > { %v4007_v60 = vmax.f32 %v2246_v14, %v1124_v54  ;;  %v2231_v4 = vmax.f32 %v4671_v61, %v969_v3  ;;  %1939 = vmatprep.mubr.f32.mxu0 %v3171_v0 }
 0x142   : > { %v971_v21 = vpop.f32.mrf.mxu0  ;;  %v1130_v18 = vpop.f32.mrf.mxu1  ;;  %3008 = vmatmul.mubr.msk.f32.gmra.mxu1 %vm423_vm1, %v3381_v22 }
 0x143   : > { %v2278_v40 = vmax.f32 %v4007_v60, %v4005_v37  ;;  %v2247_v7 = vmax.f32 %v2231_v4, %v971_v21  ;;  %2100 = vmatprep.mubr.f32.mxu1 %v3171_v0 }
 0x144   : > { %v975_v16 = vpop.f32.mrf.mxu0  ;;  %2991 = vmatmul.mubr.msk.f32.gmra.mxu0 %vm423_vm1, %v3392_v23  ;;  %v4020_v44 = vpop.f32.mrf.mxu1 }
 0x145   : > { %v4022_v10 = vmax.f32 %v2247_v7, %v1130_v18  ;;  %v2232_v19 = vmax.f32 %v4672_v12, %v975_v16  ;;  %1945 = vmatprep.mubr.f32.mxu0 %v3171_v0 }
 0x146   : > { %v977_v22 = vpop.f32.mrf.mxu0  ;;  %v1136_v47 = vpop.f32.mrf.mxu1  ;;  %3009 = vmatmul.mubr.msk.f32.gmra.mxu1 %vm423_vm1, %v3392_v23 }
 0x147   : > { %v2279_v35 = vmax.f32 %v4022_v10, %v4020_v44  ;;  %v2248_v30 = vmax.f32 %v2232_v19, %v977_v22  ;;  %2106 = vmatprep.mubr.f32.mxu1 %v3171_v0 }
 0x148   : > { %v981_v51 = vpop.f32.mrf.mxu0  ;;  %2992 = vmatmul.mubr.msk.f32.gmra.mxu0 %vm423_vm1, %v3403_v24  ;;  %v4035_v20 = vpop.f32.mrf.mxu1 }
 0x149   : > { %v4037_v38 = vmax.f32 %v2248_v30, %v1136_v47  ;;  %v2233_v54 = vmax.f32 %v4673_v39, %v981_v51  ;;  %1951 = vmatprep.mubr.f32.mxu0 %v3171_v0 }
 0x14a   : > { %v983_v23 = vpop.f32.mrf.mxu0  ;;  %v1142_v14 = vpop.f32.mrf.mxu1  ;;  %3010 = vmatmul.mubr.msk.f32.gmra.mxu1 %vm423_vm1, %v3403_v24 }
 0x14b   : > { %v2280_v3 = vmax.f32 %v4037_v38, %v4035_v20  ;;  %v2249_v61 = vmax.f32 %v2233_v54, %v983_v23  ;;  %2112 = vmatprep.mubr.f32.mxu1 %v3171_v0 }
 0x14c   : > { %v987_v4 = vpop.f32.mrf.mxu0  ;;  %2993 = vmatmul.mubr.msk.f32.gmra.mxu0 %vm423_vm1, %v3414_v25  ;;  %v4050_v21 = vpop.f32.mrf.mxu1 }
 0x14d   : > { %v4052_v49 = vmax.f32 %v2249_v61, %v1142_v14  ;;  %v2234_v18 = vmax.f32 %v4674_v52, %v987_v4  ;;  %1957 = vmatprep.mubr.f32.mxu0 %v3171_v0  ;;  %v3090_v4 = vld [vmem:[%s4652_s1 + $0x68] sm:$0xff] }
 0x14e   : > { %v989_v24 = vpop.f32.mrf.mxu0  ;;  %v1148_v7 = vpop.f32.mrf.mxu1  ;;  %3011 = vmatmul.mubr.msk.f32.gmra.mxu1 %vm423_vm1, %v3414_v25 }
 0x14f   : > { %v2281_v16 = vmax.f32 %v4052_v49, %v4050_v21  ;;  %v2250_v12 = vmax.f32 %v2234_v18, %v989_v24  ;;  %2118 = vmatprep.mubr.f32.mxu1 %v3171_v0 }
 0x150   : > { %v993_v19 = vpop.f32.mrf.mxu0  ;;  %2994 = vmatmul.mubr.msk.f32.gmra.mxu0 %vm423_vm1, %v3425_v26  ;;  %v4065_v22 = vpop.f32.mrf.mxu1 }
 0x151   : > { %v4067_v5 = vmax.f32 %v2250_v12, %v1148_v7  ;;  %v2235_v47 = vmax.f32 %v4675_v8, %v993_v19  ;;  %1963 = vmatprep.mubr.f32.mxu0 %v3171_v0  ;;  %v4677_v7 = vmax.f32 %v3875_v53, %v3873_v58 }
 0x152   : > { %v995_v25 = vpop.f32.mrf.mxu0  ;;  %v1154_v30 = vpop.f32.mrf.mxu1  ;;  %3012 = vmatmul.mubr.msk.f32.gmra.mxu1 %vm423_vm1, %v3425_v26 }
 0x153   : > { %v2282_v51 = vmax.f32 %v4067_v5, %v4065_v22  ;;  %v2251_v39 = vmax.f32 %v2235_v47, %v995_v25  ;;  %2124 = vmatprep.mubr.f32.mxu1 %v3171_v0 }
 0x154   : > { %v999_v54 = vpop.f32.mrf.mxu0  ;;  %2995 = vmatmul.mubr.msk.f32.gmra.mxu0 %vm423_vm1, %v3436_v27  ;;  %v4080_v23 = vpop.f32.mrf.mxu1 }
 0x155   : > { %v4082_v42 = vmax.f32 %v2251_v39, %v1154_v30  ;;  %v2236_v14 = vmax.f32 %v4676_v46, %v999_v54  ;;  %1969 = vmatprep.mubr.f32.mxu0 %v3171_v0  ;;  %v3092_v39 = vld [vmem:[%s4652_s1 + $0x78] sm:$0xff] }
 0x156   : > { %v1001_v26 = vpop.f32.mrf.mxu0  ;;  %v1160_v61 = vpop.f32.mrf.mxu1  ;;  %3013 = vmatmul.mubr.msk.f32.gmra.mxu1 %vm423_vm1, %v3090_v4 }
 0x157   : > { %v2283_v27 = vmax.f32 %v4082_v42, %v4080_v23  ;;  %v2252_v52 = vmax.f32 %v2236_v14, %v1001_v26  ;;  %2130 = vmatprep.mubr.f32.mxu1 %v3171_v0 }
 0x158   : > { %v1005_v18 = vpop.f32.mrf.mxu0  ;;  %2996 = vmatmul.mubr.msk.f32.gmra.mxu0 %vm423_vm1, %v3091_v13  ;;  %v4099_v31 = vpop.f32.mrf.mxu1 }
 0x159   : > { %v4101_v24 = vmax.f32 %v2252_v52, %v1160_v61  ;;  %v2237_v12 = vmax.f32 %v4677_v7, %v1005_v18  ;;  %1975 = vmatprep.mubr.f32.mxu0 %v3171_v0 }
 0x15a   : > { %v1007_v19 = vpop.f32.mrf.mxu0  ;;  %v1166_v8 = vpop.f32.mrf.mxu1  ;;  %3014 = vmatmul.mubr.msk.f32.gmra.mxu1 %vm423_vm1, %v3091_v13 }
 0x15b   : > { %v2284_v47 = vmax.f32 %v4101_v24, %v4099_v31  ;;  %v2253_v25 = vmax.f32 %v2237_v12, %v1007_v19  ;;  %2136 = vmatprep.mubr.f32.mxu1 %v3171_v0 }
 0x15c   : > { %v1011_v30 = vpop.f32.mrf.mxu0  ;;  %2997 = vmatmul.mubr.msk.f32.gmra.mxu0 %vm423_vm1, %v3092_v39  ;;  %v4115_v58 = vpop.f32.mrf.mxu1 }
 0x15d   : > { %v4117_v53 = vmax.f32 %v2253_v25, %v1166_v8  ;;  %v2238_v54 = vmax.f32 %v2222_v57, %v1011_v30 }
 0x15e   : > { %v1013_v46 = vpop.f32.mrf.mxu0  ;;  %v1172_v14 = vpop.f32.mrf.mxu1  ;;  %3015 = vmatmul.mubr.msk.f32.gmra.mxu1 %vm423_vm1, %v3092_v39 }
 0x15f   : > { %v2285_v0 = vmax.f32 %v4117_v53, %v4115_v58  ;;  %v2254_v26 = vmax.f32 %v2238_v54, %v1013_v46 }
 0x160   : > { %v1243_v61 = vpop.f32.mrf.mxu0  ;;  %v4125_v4 = vpop.f32.mrf.mxu1 }
 0x161   : > { %v4127_v52 = vmax.f32 %v2254_v26, %v1172_v14  ;;  %v2287_v18 = vmax.f32 %v2271_v2, %v1243_v61 }
 0x162   : > { %v1245_v13 = vpop.f32.mrf.mxu0  ;;  %v1404_v41 = vpop.f32.mrf.mxu1 }
 0x163   : > { %v2286_v34 = vmax.f32 %v4127_v52, %v4125_v4  ;;  %v2303_v57 = vmax.f32 %v2287_v18, %v1245_v13 }
 0x164   : > { %v1249_v7 = vpop.f32.mrf.mxu0  ;;  %v4134_v12 = vpop.f32.mrf.mxu1 }
 0x165   : > { %v4136_v19 = vmax.f32 %v2303_v57, %v1404_v41  ;;  %v2288_v8 = vmax.f32 %v2272_v28, %v1249_v7 }
 0x166   : > { %v1251_v25 = vpop.f32.mrf.mxu0  ;;  %v1410_v30 = vpop.f32.mrf.mxu1 }
 0x167   : > { %v2304_v55 = vmax.f32 %v2288_v8, %v1251_v25 }
 0x168   : > { %v1255_v2 = vpop.f32.mrf.mxu0  ;;  %v4143_v39 = vpop.f32.mrf.mxu1 }
 0x169   : > { %v4145_v54 = vmax.f32 %v2304_v55, %v1410_v30  ;;  %v2289_v46 = vmax.f32 %v2273_v9, %v1255_v2 }
 0x16a   : > { %v1257_v14 = vpop.f32.mrf.mxu0  ;;  %v1416_v26 = vpop.f32.mrf.mxu1 }
 0x16b   : > { %v2305_v62 = vmax.f32 %v2289_v46, %v1257_v14 }
 0x16c   : > { %v1261_v28 = vpop.f32.mrf.mxu0  ;;  %v4152_v61 = vpop.f32.mrf.mxu1 }
 0x16d   : > { %v4154_v18 = vmax.f32 %v2305_v62, %v1416_v26  ;;  %v2290_v13 = vmax.f32 %v2274_v63, %v1261_v28 }
 0x16e   : > { %v1263_v41 = vpop.f32.mrf.mxu0  ;;  %v1422_v57 = vpop.f32.mrf.mxu1 }
 0x16f   : > { %v2306_v6 = vmax.f32 %v2290_v13, %v1263_v41 }
 0x170   : > { %v1267_v9 = vpop.f32.mrf.mxu0  ;;  %v4161_v7 = vpop.f32.mrf.mxu1 }
 0x171   : > { %v4163_v8 = vmax.f32 %v2306_v6, %v1422_v57  ;;  %v2291_v25 = vmax.f32 %v2275_v1, %v1267_v9 }
 0x172   : > { %v1269_v30 = vpop.f32.mrf.mxu0  ;;  %v1428_v55 = vpop.f32.mrf.mxu1 }
 0x173   : > { %v2307_v15 = vmax.f32 %v2291_v25, %v1269_v30 }
 0x174   : > { %v1273_v63 = vpop.f32.mrf.mxu0  ;;  %v4170_v2 = vpop.f32.mrf.mxu1 }
 0x175   : > { %v4172_v46 = vmax.f32 %v2307_v15, %v1428_v55  ;;  %v2292_v14 = vmax.f32 %v2276_v59, %v1273_v63 }
 0x176   : > { %v1275_v26 = vpop.f32.mrf.mxu0  ;;  %v1434_v62 = vpop.f32.mrf.mxu1 }
 0x177   : > { %v2308_v36 = vmax.f32 %v2292_v14, %v1275_v26 }
 0x178   : > { %v1279_v1 = vpop.f32.mrf.mxu0  ;;  %v4179_v28 = vpop.f32.mrf.mxu1 }
 0x179   : > { %v4181_v13 = vmax.f32 %v2308_v36, %v1434_v62  ;;  %v2293_v41 = vmax.f32 %v2277_v33, %v1279_v1 }
 0x17a   : > { %v1281_v57 = vpop.f32.mrf.mxu0  ;;  %v1440_v6 = vpop.f32.mrf.mxu1 }
 0x17b   : > { %v2309_v43 = vmax.f32 %v2293_v41, %v1281_v57 }
 0x17c   : > { %v1285_v59 = vpop.f32.mrf.mxu0  ;;  %v4188_v9 = vpop.f32.mrf.mxu1 }
 0x17d   : > { %v4190_v25 = vmax.f32 %v2309_v43, %v1440_v6  ;;  %v2294_v30 = vmax.f32 %v2278_v40, %v1285_v59 }
 0x17e   : > { %v1287_v55 = vpop.f32.mrf.mxu0  ;;  %v1446_v15 = vpop.f32.mrf.mxu1 }
 0x17f   : > { %v2310_v50 = vmax.f32 %v2294_v30, %v1287_v55 }
 0x180   : > { %v1291_v33 = vpop.f32.mrf.mxu0  ;;  %v4197_v63 = vpop.f32.mrf.mxu1 }
 0x181   : > { %v4199_v14 = vmax.f32 %v2310_v50, %v1446_v15  ;;  %v2295_v26 = vmax.f32 %v2279_v35, %v1291_v33 }
 0x182   : > { %v1293_v62 = vpop.f32.mrf.mxu0  ;;  %v1452_v36 = vpop.f32.mrf.mxu1 }
 0x183   : > { %v2311_v60 = vmax.f32 %v2295_v26, %v1293_v62 }
 0x184   : > { %v1297_v40 = vpop.f32.mrf.mxu0  ;;  %v4206_v1 = vpop.f32.mrf.mxu1 }
 0x185   : > { %v4208_v41 = vmax.f32 %v2311_v60, %v1452_v36  ;;  %v2296_v57 = vmax.f32 %v2280_v3, %v1297_v40 }
 0x186   : > { %v1299_v6 = vpop.f32.mrf.mxu0  ;;  %v1458_v43 = vpop.f32.mrf.mxu1 }
 0x187   : > { %v2312_v10 = vmax.f32 %v2296_v57, %v1299_v6 }
 0x188   : > { %v1303_v35 = vpop.f32.mrf.mxu0  ;;  %v4215_v59 = vpop.f32.mrf.mxu1 }
 0x189   : > { %v4217_v30 = vmax.f32 %v2312_v10, %v1458_v43  ;;  %v2297_v55 = vmax.f32 %v2281_v16, %v1303_v35 }
 0x18a   : > { %v1305_v15 = vpop.f32.mrf.mxu0  ;;  %v1464_v50 = vpop.f32.mrf.mxu1 }
 0x18b   : > { %v2313_v38 = vmax.f32 %v2297_v55, %v1305_v15 }
 0x18c   : > { %v1309_v3 = vpop.f32.mrf.mxu0  ;;  %v4224_v33 = vpop.f32.mrf.mxu1 }
 0x18d   : > { %4678 = vst [vmem:[#allocation6_spill] sm:$0xff] %v4224_v33  ;;  %v4226_v26 = vmax.f32 %v2313_v38, %v1464_v50  ;;  %v2298_v62 = vmax.f32 %v2282_v51, %v1309_v3 }
 0x18e   : > { %v1311_v36 = vpop.f32.mrf.mxu0  ;;  %v1470_v60 = vpop.f32.mrf.mxu1 }
 0x18f   : > { %4679 = vst [vmem:[#allocation7_spill] sm:$0xff] %v4226_v26  ;;  %v2314_v49 = vmax.f32 %v2298_v62, %v1311_v36 }
 0x190   : > { %v1315_v16 = vpop.f32.mrf.mxu0  ;;  %v4233_v40 = vpop.f32.mrf.mxu1 }
 0x191   : > { %4680 = vst [vmem:[#allocation8_spill] sm:$0xff] %v4233_v40  ;;  %v4235_v57 = vmax.f32 %v2314_v49, %v1470_v60  ;;  %v2299_v6 = vmax.f32 %v2283_v27, %v1315_v16 }
 0x192   : > { %v1317_v43 = vpop.f32.mrf.mxu0  ;;  %v1476_v10 = vpop.f32.mrf.mxu1 }
 0x193   : > { %4681 = vst [vmem:[#allocation9_spill] sm:$0xff] %v4235_v57  ;;  %v2315_v5 = vmax.f32 %v2299_v6, %v1317_v43 }
 0x194   : > { %v1321_v51 = vpop.f32.mrf.mxu0  ;;  %v4242_v35 = vpop.f32.mrf.mxu1 }
 0x195   : > { %4682 = vst [vmem:[#allocation10_spill] sm:$0xff] %v4242_v35  ;;  %v4244_v55 = vmax.f32 %v2315_v5, %v1476_v10  ;;  %v2300_v15 = vmax.f32 %v2284_v47, %v1321_v51 }
 0x196   : > { %v1323_v50 = vpop.f32.mrf.mxu0  ;;  %v1482_v38 = vpop.f32.mrf.mxu1 }
 0x197   : > { %4683 = vst [vmem:[#allocation11_spill] sm:$0xff] %v4244_v55  ;;  %v2316_v42 = vmax.f32 %v2300_v15, %v1323_v50 }
 0x198   : > { %v1327_v27 = vpop.f32.mrf.mxu0  ;;  %v4251_v3 = vpop.f32.mrf.mxu1 }
 0x199   : > { %4684 = vst [vmem:[#allocation12_spill] sm:$0xff] %v4251_v3  ;;  %v4253_v62 = vmax.f32 %v2316_v42, %v1482_v38  ;;  %v2301_v36 = vmax.f32 %v2285_v0, %v1327_v27 }
 0x19a   : > { %v1329_v60 = vpop.f32.mrf.mxu0  ;;  %v1488_v49 = vpop.f32.mrf.mxu1 }
 0x19b   : > { %4685 = vst [vmem:[#allocation13_spill] sm:$0xff] %v4253_v62  ;;  %v2317_v24 = vmax.f32 %v2301_v36, %v1329_v60 }
 0x19c   : > { %v1333_v47 = vpop.f32.mrf.mxu0  ;;  %v4260_v16 = vpop.f32.mrf.mxu1 }
 0x19d   : > { %4686 = vst [vmem:[#allocation14_spill] sm:$0xff] %v4260_v16  ;;  %v4262_v6 = vmax.f32 %v2317_v24, %v1488_v49  ;;  %v2302_v43 = vmax.f32 %v2286_v34, %v1333_v47 }
 0x19e   : > { %v1335_v10 = vpop.f32.mrf.mxu0  ;;  %v1494_v5 = vpop.f32.mrf.mxu1 }
 0x19f   : > { %4687 = vst [vmem:[#allocation15_spill] sm:$0xff] %v4262_v6  ;;  %v2318_v53 = vmax.f32 %v2302_v43, %v1335_v10 }
 0x1a0   : > { %v1565_v0 = vpop.f32.mrf.mxu0  ;;  %v4269_v51 = vpop.f32.mrf.mxu1 }
 0x1a1   : > { %4688 = vst [vmem:[#allocation16_spill] sm:$0xff] %v4269_v51  ;;  %v4271_v15 = vmax.f32 %v2318_v53, %v1494_v5 }
 0x1a2   : > { %v4273_v50 = vpop.f32.mrf.mxu0  ;;  %v1726_v38 = vpop.f32.mrf.mxu1 }
 0x1a3   : > { %4689 = vst [vmem:[#allocation17_spill] sm:$0xff] %v4271_v15 }
 0x1a4   : > { %v1571_v27 = vpop.f32.mrf.mxu0  ;;  %v4277_v4 = vpop.f32.mrf.mxu1 }
 0x1a6   : > { %v4279_v52 = vpop.f32.mrf.mxu0  ;;  %v4281_v34 = vpop.f32.mrf.mxu1 }
 0x1a8   : > { %v1577_v36 = vpop.f32.mrf.mxu0  ;;  %v4283_v60 = vpop.f32.mrf.mxu1 }
 0x1aa   : > { %v4285_v49 = vpop.f32.mrf.mxu0  ;;  %v4287_v24 = vpop.f32.mrf.mxu1 }
 0x1ac   : > { %v1583_v47 = vpop.f32.mrf.mxu0  ;;  %v4289_v43 = vpop.f32.mrf.mxu1 }
 0x1ae   : > { %v4291_v10 = vpop.f32.mrf.mxu0  ;;  %v4293_v5 = vpop.f32.mrf.mxu1 }
 0x1b0   : > { %v1589_v53 = vpop.f32.mrf.mxu0  ;;  %v4295_v42 = vpop.f32.mrf.mxu1 }
 0x1b2   : > { %v4297_v58 = vpop.f32.mrf.mxu0  ;;  %v4299_v31 = vpop.f32.mrf.mxu1 }
 0x1b4   : > { %v4301_v23 = vpop.f32.mrf.mxu0  ;;  %v4303_v22 = vpop.f32.mrf.mxu1 }
 0x1b6   : > { %v4305_v21 = vpop.f32.mrf.mxu0  ;;  %v4307_v20 = vpop.f32.mrf.mxu1 }
 0x1b8   : > { %v4309_v44 = vpop.f32.mrf.mxu0  ;;  %v4311_v37 = vpop.f32.mrf.mxu1 }
 0x1ba   : > { %v4313_v17 = vpop.f32.mrf.mxu0  ;;  %v4315_v11 = vpop.f32.mrf.mxu1 }
 0x1bc   : > { %v4317_v29 = vpop.f32.mrf.mxu0  ;;  %v4319_v48 = vpop.f32.mrf.mxu1 }
 0x1be   : > { %v4321_v56 = vpop.f32.mrf.mxu0  ;;  %v4323_v32 = vpop.f32.mrf.mxu1 }
 0x1bf   : > { %4690 = vst [vmem:[#allocation18_spill] sm:$0xff] %v4323_v32 }
 0x1c0   : > { %v4325_v45 = vpop.f32.mrf.mxu0  ;;  %v4327_v51 = vpop.f32.mrf.mxu1 }
 0x1c1   : > { %4691 = vst [vmem:[#allocation19_spill] sm:$0xff] %v4327_v51 }
 0x1c2   : > { %v4329_v15 = vpop.f32.mrf.mxu0  ;;  %v4331_v16 = vpop.f32.mrf.mxu1 }
 0x1c3   : > { %4692 = vst [vmem:[#allocation20_spill] sm:$0xff] %v4331_v16 }
 0x1c4   : > { %v4333_v6 = vpop.f32.mrf.mxu0  ;;  %v4335_v3 = vpop.f32.mrf.mxu1 }
 0x1c5   : > { %4693 = vst [vmem:[#allocation21_spill] sm:$0xff] %v4335_v3 }
 0x1c6   : > { %v4337_v62 = vpop.f32.mrf.mxu0  ;;  %v4339_v35 = vpop.f32.mrf.mxu1 }
 0x1c7   : > { %4694 = vst [vmem:[#allocation22_spill] sm:$0xff] %v4337_v62  ;;  %4695 = vst [vmem:[#allocation23_spill] sm:$0xff] %v4339_v35 }
 0x1c8   : > { %v4341_v55 = vpop.f32.mrf.mxu0  ;;  %v4343_v40 = vpop.f32.mrf.mxu1 }
 0x1c9   : > { %4696 = vst [vmem:[#allocation24_spill] sm:$0xff] %v4341_v55  ;;  %4697 = vst [vmem:[#allocation25_spill] sm:$0xff] %v4343_v40  ;;  %v4708_v40 = vmax.f32 %v4136_v19, %v4134_v12 }
 0x1ca   : > { %v4345_v57 = vpop.f32.mrf.mxu0  ;;  %v4347_v33 = vpop.f32.mrf.mxu1 }
 0x1cb   : > { %4698 = vst [vmem:[#allocation26_spill] sm:$0xff] %v4345_v57  ;;  %4699 = vst [vmem:[#allocation27_spill] sm:$0xff] %v4347_v33  ;;  %v2351_v33 = vmax.f32 %v4708_v40, %v1565_v0 }
 0x1cc   : > { %v4349_v26 = vpop.f32.mrf.mxu0  ;;  %v4351_v51 = vpop.f32.mrf.mxu1 }
 0x1cd   : > { %4700 = vst [vmem:[#allocation28_spill] sm:$0xff] %v4349_v26  ;;  %4701 = vst [vmem:[#allocation29_spill] sm:$0xff] %v4351_v51 }
 0x1ce   : > { %v4353_v16 = vpop.f32.mrf.mxu0  ;;  %v4355_v32 = vpop.f32.mrf.mxu1 }
 0x1cf   : > { %4702 = vst [vmem:[#allocation30_spill] sm:$0xff] %v4353_v16  ;;  %4703 = vst [vmem:[#allocation31_spill] sm:$0xff] %v4355_v32  ;;  %v2367_v32 = vmax.f32 %v2351_v33, %v4273_v50 }
 0x1d0   : > { %v4357_v3 = vpop.f32.mrf.mxu0  ;;  %v4359_v62 = vpop.f32.mrf.mxu1 }
 0x1d1   : > { %4704 = vst [vmem:[#allocation32_spill] sm:$0xff] %v4357_v3  ;;  %4705 = vst [vmem:[#allocation33_spill] sm:$0xff] %v4359_v62  ;;  %v4711_v62 = vmax.f32 %v4145_v54, %v4143_v39  ;;  %v2383_v40 = vmax.f32 %v2367_v32, %v1726_v38 }
 0x1d2   : > { %v4361_v35 = vpop.f32.mrf.mxu0  ;;  %v4363_v55 = vpop.f32.mrf.mxu1 }
 0x1d3   : > { %4706 = vst [vmem:[#allocation34_spill] sm:$0xff] %v4361_v35  ;;  %4707 = vst [vmem:[#allocation35_spill] sm:$0xff] %v4363_v55  ;;  %v2352_v35 = vmax.f32 %v4711_v62, %v1571_v27  ;;  %v2399_v62 = vmax.f32 %v2383_v40, %v4277_v4 }
 0x1d4   : > { %v4368_v57 = vpop.f32.mrf.mxu0  ;;  %v4370_v26 = vpop.f32.mrf.mxu1 }
 0x1d5   : > { %4709 = vst [vmem:[#allocation36_spill] sm:$0xff] %v4370_v26  ;;  %v2368_v0 = vmax.f32 %v2352_v35, %v4279_v52  ;;  %v4715_v35 = vmax.f32 %v4163_v8, %v4161_v7  ;;  %v4716_v52 = vmax.f32 %v4172_v46, %v4170_v2  ;;  %v4717_v2 = vmax.f32 %v4181_v13, %v4179_v28 }
 0x1d6   : > { %v4372_v51 = vpop.f32.mrf.mxu0  ;;  %v4374_v16 = vpop.f32.mrf.mxu1 }
 0x1d7   : > { %4710 = vst [vmem:[#allocation37_spill] sm:$0xff] %v4374_v16  ;;  %v4712_v16 = vmax.f32 %v4154_v18, %v4152_v61  ;;  %v2384_v27 = vmax.f32 %v2368_v0, %v4281_v34  ;;  %v2354_v38 = vmax.f32 %v4715_v35, %v1583_v47  ;;  %v2356_v46 = vmax.f32 %v4717_v2, %v4301_v23 }
 0x1d8   : > { %v4380_v3 = vpop.f32.mrf.mxu0  ;;  %v4382_v55 = vpop.f32.mrf.mxu1  ;;  %v4718_v23 = vmax.f32 %v4190_v25, %v4188_v9  ;;  %v4719_v9 = vmax.f32 %v4199_v14, %v4197_v63 }
 0x1d9   : > { %v2353_v26 = vmax.f32 %v4712_v16, %v1577_v36  ;;  %v2355_v36 = vmax.f32 %v4716_v52, %v1589_v53  ;;  %v2400_v4 = vmax.f32 %v2384_v27, %v4283_v60 }
 0x1da   : > { %v4384_v12 = vpop.f32.mrf.mxu0  ;;  %v4386_v19 = vpop.f32.mrf.mxu1  ;;  %v2358_v25 = vmax.f32 %v4719_v9, %v4317_v29 }
 0x1db   : > { %v2369_v32 = vmax.f32 %v2353_v26, %v4285_v49  ;;  %v2370_v26 = vmax.f32 %v2354_v38, %v4291_v10  ;;  %v2371_v0 = vmax.f32 %v2355_v36, %v4297_v58  ;;  %v2372_v38 = vmax.f32 %v2356_v46, %v4305_v21 }
 0x1dc   : > { %v4392_v33 = vpop.f32.mrf.mxu0  ;;  %v4394_v50 = vpop.f32.mrf.mxu1  ;;  %v2374_v29 = vmax.f32 %v2358_v25, %v4321_v56  ;;  %v4731_v25 = vld [vmem:[#allocation23_spill] sm:$0xff] }
 0x1dd   : > { %4713 = vst [vmem:[#allocation38_spill] sm:$0xff] %v4394_v50  ;;  %v2385_v34 = vmax.f32 %v2369_v32, %v4287_v24  ;;  %v2386_v24 = vmax.f32 %v2370_v26, %v4293_v5  ;;  %v2387_v58 = vmax.f32 %v2371_v0, %v4299_v31  ;;  %v2388_v21 = vmax.f32 %v2372_v38, %v4307_v20 }
 0x1de   : > { %v4396_v39 = vpop.f32.mrf.mxu0  ;;  %v4398_v54 = vpop.f32.mrf.mxu1  ;;  %v4720_v20 = vmax.f32 %v4208_v41, %v4206_v1  ;;  %v4721_v1 = vmax.f32 %v4217_v30, %v4215_v59  ;;  %v4725_v30 = vld [vmem:[#allocation19_spill] sm:$0xff] }
 0x1df   : > { %4714 = vst [vmem:[#allocation39_spill] sm:$0xff] %v4398_v54  ;;  %v2401_v60 = vmax.f32 %v2385_v34, %v4289_v43  ;;  %v2402_v13 = vmax.f32 %v2386_v24, %v4295_v42  ;;  %v2357_v43 = vmax.f32 %v4718_v23, %v4309_v44  ;;  %v2403_v31 = vmax.f32 %v2387_v58, %v4303_v22 }
 0x1e0   : > { %v1887_v61 = vpop.f32.mrf.mxu0  ;;  %v4406_v18 = vpop.f32.mrf.mxu1  ;;  %v2404_v22 = vmax.f32 %v2388_v21, %v4311_v37  ;;  %v2359_v2 = vmax.f32 %v4720_v20, %v4325_v45  ;;  %v2360_v45 = vmax.f32 %v4721_v1, %v4333_v6  ;;  %v4735_v20 = vld [vmem:[#allocation8_spill] sm:$0xff]  ;;  %v4740_v1 = vld [vmem:[#allocation10_spill] sm:$0xff] }
 0x1e1   : > { %v2415_v16 = vmax.f32 %v2399_v62, %v1887_v61  ;;  %v2373_v42 = vmax.f32 %v2357_v43, %v4313_v17 }
 0x1e2   : > { %v1889_v50 = vpop.f32.mrf.mxu0  ;;  %v2048_v54 = vpop.f32.mrf.mxu1  ;;  %v2375_v37 = vmax.f32 %v2359_v2, %v4329_v15 }
 0x1e3   : > { %v2431_v49 = vmax.f32 %v2415_v16, %v1889_v50 }
 0x1e4   : > { %v1893_v40 = vpop.f32.mrf.mxu0  ;;  %v2050_v7 = vpop.f32.mrf.mxu1 }
 0x1e5   : > { %v2447_v8 = vmax.f32 %v2431_v49, %v2048_v54  ;;  %v2416_v47 = vmax.f32 %v2400_v4, %v1893_v40 }
 0x1e6   : > { %v1895_v53 = vpop.f32.mrf.mxu0  ;;  %v2054_v62 = vpop.f32.mrf.mxu1 }
 0x1e7   : > { %v2463_v27 = vmax.f32 %v2447_v8, %v2050_v7  ;;  %v2432_v10 = vmax.f32 %v2416_v47, %v1895_v53  ;;  %v2389_v53 = vmax.f32 %v2373_v42, %v4315_v11  ;;  %v4730_v42 = vld [vmem:[#allocation21_spill] sm:$0xff] }
 0x1e8   : > { %v1899_v50 = vpop.f32.mrf.mxu0  ;;  %v2056_v32 = vpop.f32.mrf.mxu1 }
 0x1e9   : > { %v2448_v35 = vmax.f32 %v2432_v10, %v2054_v62  ;;  %v2417_v54 = vmax.f32 %v2401_v60, %v1899_v50  ;;  %2514 = vmax.xlane.f32.xlu0 %v2463_v27  ;;  %v2405_v11 = vmax.f32 %v2389_v53, %v4319_v48  ;;  %v4722_v50 = vld [vmem:[#allocation18_spill] sm:$0xff] }
 0x1ea   : > { %v1901_v61 = vpop.f32.mrf.mxu0  ;;  %v2060_v28 = vpop.f32.mrf.mxu1  ;;  %v2390_v56 = vmax.f32 %v2374_v29, %v4722_v50  ;;  %v4728_v48 = vld [vmem:[#allocation6_spill] sm:$0xff]  ;;  %v4742_v50 = vld [vmem:[#allocation27_spill] sm:$0xff] }
 0x1eb   : > { %v2433_v5 = vmax.f32 %v2417_v54, %v1901_v61  ;;  %v2464_v16 = vmax.f32 %v2448_v35, %v2056_v32 }
 0x1ec   : > { %v1905_v52 = vpop.f32.mrf.mxu0  ;;  %v2062_v36 = vpop.f32.mrf.mxu1  ;;  %v2406_v6 = vmax.f32 %v2390_v56, %v4725_v30 }
 0x1ed   : > { %v2449_v4 = vmax.f32 %v2433_v5, %v2060_v28  ;;  %v2418_v34 = vmax.f32 %v2402_v13, %v1905_v52  ;;  %2516 = vmax.xlane.f32.xlu1 %v2464_v16  ;;  %v4723_v28 = vld [vmem:[#allocation20_spill] sm:$0xff]  ;;  %v4724_v13 = vld [vmem:[#allocation22_spill] sm:$0xff]  ;;  %v4727_v16 = vld [vmem:[#allocation7_spill] sm:$0xff] }
 0x1ee   : > { %v1907_v26 = vpop.f32.mrf.mxu0  ;;  %v2066_v49 = vpop.f32.mrf.mxu1  ;;  %v2391_v15 = vmax.f32 %v2375_v37, %v4723_v28  ;;  %v2376_v23 = vmax.f32 %v2360_v45, %v4724_v13  ;;  %v4726_v5 = vld [vmem:[#allocation24_spill] sm:$0xff]  ;;  %v4729_v52 = vmax.f32 %v4727_v16, %v4728_v48  ;;  %v4739_v37 = vld [vmem:[#allocation11_spill] sm:$0xff]  ;;  %v4744_v13 = vld [vmem:[#allocation34_spill] sm:$0xff] }
 0x1ef   : > { %v2465_v44 = vmax.f32 %v2449_v4, %v2062_v36  ;;  %v2434_v40 = vmax.f32 %v2418_v34, %v1907_v26  ;;  %v4741_v45 = vmax.f32 %v4739_v37, %v4740_v1  ;;  %v4748_v48 = vld [vmem:[#allocation29_spill] sm:$0xff] }
 0x1f0   : > { %v1911_v7 = vpop.f32.mrf.mxu0  ;;  %v2068_v8 = vpop.f32.mrf.mxu1  ;;  %v2361_v36 = vmax.f32 %v4729_v52, %v4726_v5  ;;  %v2407_v9 = vmax.f32 %v2391_v15, %v4730_v42  ;;  %v4757_v1 = vld [vmem:[#allocation17_spill] sm:$0xff] }
 0x1f1   : > { %v2450_v47 = vmax.f32 %v2434_v40, %v2066_v49  ;;  %v2419_v0 = vmax.f32 %v2403_v31, %v1911_v7  ;;  %2518 = vmax.xlane.f32.xlu1 %v2465_v44  ;;  %v2392_v44 = vmax.f32 %v2376_v23, %v4731_v25 }
 0x1f2   : > { %v1913_v17 = vpop.f32.mrf.mxu0  ;;  %v2072_v46 = vpop.f32.mrf.mxu1 }
 0x1f3   : > { %v2466_v63 = vmax.f32 %v2450_v47, %v2068_v8  ;;  %v2435_v14 = vmax.f32 %v2419_v0, %v1913_v17  ;;  %v4732_v8 = vld [vmem:[#allocation26_spill] sm:$0xff]  ;;  %v4733_v0 = vld [vmem:[#allocation28_spill] sm:$0xff] }
 0x1f4   : > { %v1917_v62 = vpop.f32.mrf.mxu0  ;;  %v2074_v60 = vpop.f32.mrf.mxu1  ;;  %v2377_v47 = vmax.f32 %v2361_v36, %v4732_v8  ;;  %v4749_v36 = vld [vmem:[#allocation31_spill] sm:$0xff] }
 0x1f5   : > { %v2451_v24 = vmax.f32 %v2435_v14, %v2072_v46  ;;  %v2420_v27 = vmax.f32 %v2404_v22, %v1917_v62  ;;  %2520 = vmax.xlane.f32.xlu1 %v2466_v63  ;;  %v4734_v22 = vld [vmem:[#allocation9_spill] sm:$0xff] }
 0x1f6   : > { %v1919_v41 = vpop.f32.mrf.mxu0  ;;  %v2078_v10 = vpop.f32.mrf.mxu1  ;;  %v4736_v2 = vmax.f32 %v4734_v22, %v4735_v20  ;;  %v2393_v56 = vmax.f32 %v2377_v47, %v4742_v50  ;;  %v4752_v47 = vld [vmem:[#allocation15_spill] sm:$0xff] }
 0x1f7   : > { %v2467_v32 = vmax.f32 %v2451_v24, %v2074_v60  ;;  %v2436_v35 = vmax.f32 %v2420_v27, %v1919_v41  ;;  %v4737_v60 = vld [vmem:[#allocation25_spill] sm:$0xff]  ;;  %v4738_v27 = vld [vmem:[#allocation32_spill] sm:$0xff] }
 0x1f8   : > { %v1923_v54 = vpop.f32.mrf.mxu0  ;;  %v2080_v58 = vpop.f32.mrf.mxu1  ;;  %v2362_v17 = vmax.f32 %v4736_v2, %v4733_v0  ;;  %v2408_v24 = vmax.f32 %v2392_v44, %v4737_v60  ;;  %v2363_v41 = vmax.f32 %v4741_v45, %v4738_v27  ;;  %v2409_v52 = vmax.f32 %v2393_v56, %v4748_v48  ;;  %v4753_v0 = vld [vmem:[#allocation14_spill] sm:$0xff]  ;;  %v4756_v60 = vld [vmem:[#allocation37_spill] sm:$0xff]  ;;  %v4758_v45 = vld [vmem:[#allocation16_spill] sm:$0xff] }
 0x1f9   : > { %v2452_v38 = vmax.f32 %v2436_v35, %v2078_v10  ;;  %v2421_v61 = vmax.f32 %v2405_v11, %v1923_v54  ;;  %2522 = vmax.xlane.f32.xlu1 %v2467_v32  ;;  %v4743_v32 = vld [vmem:[#allocation30_spill] sm:$0xff]  ;;  %v4754_v22 = vmax.f32 %v4752_v47, %v4753_v0 }
 0x1fa   : > { %v1925_v43 = vpop.f32.mrf.mxu0  ;;  %v2084_v59 = vpop.f32.mrf.mxu1  ;;  %v2378_v35 = vmax.f32 %v2362_v17, %v4743_v32  ;;  %v2379_v23 = vmax.f32 %v2363_v41, %v4744_v13  ;;  %v4759_v41 = vmax.f32 %v4757_v1, %v4758_v45  ;;  %v2550_v1 = vld [vmem:[%s4653_s2 + $0x20] sm:$0xff] }
 0x1fb   : > { %v2468_v4 = vmax.f32 %v2452_v38, %v2080_v58  ;;  %v2437_v34 = vmax.f32 %v2421_v61, %v1925_v43  ;;  %v4745_v43 = vld [vmem:[#allocation13_spill] sm:$0xff]  ;;  %v2365_v20 = vmax.f32 %v4754_v22, %v4380_v3 }
 0x1fc   : > { %v1929_v31 = vpop.f32.mrf.mxu0  ;;  %v2086_v21 = vpop.f32.mrf.mxu1  ;;  %v2366_v3 = vmax.f32 %v4759_v41, %v4392_v33 }
 0x1fd   : > { %v2453_v26 = vmax.f32 %v2437_v34, %v2084_v59  ;;  %v2422_v49 = vmax.f32 %v2406_v6, %v1929_v31  ;;  %2524 = vmax.xlane.f32.xlu1 %v2468_v4  ;;  %v4746_v59 = vld [vmem:[#allocation12_spill] sm:$0xff]  ;;  %v2394_v4 = vmax.f32 %v2378_v35, %v4749_v36  ;;  %v2381_v37 = vmax.f32 %v2365_v20, %v4384_v12 }
 0x1fe   : > { %v1931_v40 = vpop.f32.mrf.mxu0  ;;  %v2090_v7 = vpop.f32.mrf.mxu1  ;;  %v4747_v30 = vmax.f32 %v4745_v43, %v4746_v59  ;;  %v2382_v12 = vmax.f32 %v2366_v3, %v4396_v39 }
 0x1ff   : > { %v2469_v46 = vmax.f32 %v2453_v26, %v2086_v21  ;;  %v2438_v53 = vmax.f32 %v2422_v49, %v1931_v40 }
 0x200   : > { %v1935_v29 = vpop.f32.mrf.mxu0  ;;  %v2092_v63 = vpop.f32.mrf.mxu1  ;;  %v2364_v6 = vmax.f32 %v4747_v30, %v4368_v57  ;;  %v4751_v57 = vld [vmem:[#allocation33_spill] sm:$0xff] }
 0x201   : > { %v2454_v14 = vmax.f32 %v2438_v53, %v2090_v7  ;;  %v2423_v62 = vmax.f32 %v2407_v9, %v1935_v29  ;;  %2526 = vmax.xlane.f32.xlu1 %v2469_v46  ;;  %v4750_v9 = vld [vmem:[#allocation35_spill] sm:$0xff]  ;;  %v2410_v8 = vmax.f32 %v2394_v4, %v4751_v57 }
 0x202   : > { %v1937_v10 = vpop.f32.mrf.mxu0  ;;  %v2096_v11 = vpop.f32.mrf.mxu1  ;;  %v2395_v25 = vmax.f32 %v2379_v23, %v4750_v9  ;;  %v2380_v44 = vmax.f32 %v2364_v6, %v4372_v51  ;;  %v4760_v6 = vld [vmem:[#allocation38_spill] sm:$0xff] }
 0x203   : > { %v2470_v54 = vmax.f32 %v2454_v14, %v2092_v63  ;;  %v2439_v58 = vmax.f32 %v2423_v62, %v1937_v10  ;;  %v4755_v14 = vld [vmem:[#allocation36_spill] sm:$0xff] }
 0x204   : > { %v1941_v38 = vpop.f32.mrf.mxu0  ;;  %v2098_v61 = vpop.f32.mrf.mxu1  ;;  %v2411_v62 = vmax.f32 %v2395_v25, %v4755_v14  ;;  %v2396_v51 = vmax.f32 %v2380_v44, %v4756_v60 }
 0x205   : > { %v2455_v28 = vmax.f32 %v2439_v58, %v2096_v11  ;;  %v2424_v15 = vmax.f32 %v2408_v24, %v1941_v38  ;;  %2528 = vmax.xlane.f32.xlu1 %v2470_v54 }
 0x206   : > { %v1943_v5 = vpop.f32.mrf.mxu0  ;;  %v2102_v16 = vpop.f32.mrf.mxu1  ;;  %v2412_v54 = vmax.f32 %v2396_v51, %v4382_v55  ;;  %v2549_v51 = vld [vmem:[%s4653_s2 + $0x18] sm:$0xff] }
 0x207   : > { %v2471_v34 = vmax.f32 %v2455_v28, %v2098_v61  ;;  %v2440_v31 = vmax.f32 %v2424_v15, %v1943_v5  ;;  %v2397_v61 = vmax.f32 %v2381_v37, %v4386_v19 }
 0x208   : > { %v1947_v21 = vpop.f32.mrf.mxu0  ;;  %v2104_v26 = vpop.f32.mrf.mxu1 }
 0x209   : > { %v2456_v49 = vmax.f32 %v2440_v31, %v2102_v16  ;;  %v2425_v42 = vmax.f32 %v2409_v52, %v1947_v21  ;;  %2530 = vmax.xlane.f32.xlu1 %v2471_v34  ;;  %v2413_v5 = vmax.f32 %v2397_v61, %v4760_v6  ;;  %v4761_v16 = vld [vmem:[#allocation39_spill] sm:$0xff] }
 0x20a   : > { %v1949_v40 = vpop.f32.mrf.mxu0  ;;  %v2108_v7 = vpop.f32.mrf.mxu1  ;;  %v2398_v48 = vmax.f32 %v2382_v12, %v4761_v16 }
 0x20b   : > { %v2472_v2 = vmax.f32 %v2456_v49, %v2104_v26  ;;  %v2441_v17 = vmax.f32 %v2425_v42, %v1949_v40 }
 0x20c   : > { %v1953_v46 = vpop.f32.mrf.mxu0  ;;  %v2110_v53 = vpop.f32.mrf.mxu1  ;;  %v2414_v21 = vmax.f32 %v2398_v48, %v4406_v18  ;;  %v2546_v18 = vld [vmem:[%s4653_s2] sm:$0xff] }
 0x20d   : > { %v2457_v29 = vmax.f32 %v2441_v17, %v2108_v7  ;;  %v2426_v63 = vmax.f32 %v2410_v8, %v1953_v46  ;;  %2532 = vmax.xlane.f32.xlu1 %v2472_v2  ;;  %v2547_v17 = vld [vmem:[%s4653_s2 + $0x8] sm:$0xff] }
 0x20e   : > { %v1955_v24 = vpop.f32.mrf.mxu0  ;;  %v2114_v27 = vpop.f32.mrf.mxu1 }
 0x20f   : > { %v2473_v10 = vmax.f32 %v2457_v29, %v2110_v53  ;;  %v2442_v11 = vmax.f32 %v2426_v63, %v1955_v24  ;;  %v2548_v63 = vld [vmem:[%s4653_s2 + $0x10] sm:$0xff] }
 0x210   : > { %v1959_v50 = vpop.f32.mrf.mxu0  ;;  %v2116_v56 = vpop.f32.mrf.mxu1 }
 0x211   : > { %v2458_v32 = vmax.f32 %v2442_v11, %v2114_v27  ;;  %v2427_v35 = vmax.f32 %v2411_v62, %v1959_v50  ;;  %2534 = vmax.xlane.f32.xlu0 %v2473_v10  ;;  %v2551_v10 = vld [vmem:[%s4653_s2 + $0x28] sm:$0xff] }
 0x212   : > { %v1961_v58 = vpop.f32.mrf.mxu0  ;;  %v2120_v38 = vpop.f32.mrf.mxu1 }
 0x213   : > { %v2474_v28 = vmax.f32 %v2458_v32, %v2116_v56  ;;  %v2443_v15 = vmax.f32 %v2427_v35, %v1961_v58  ;;  %v2552_v32 = vld [vmem:[%s4653_s2 + $0x30] sm:$0xff] }
 0x214   : > { %v1965_v13 = vpop.f32.mrf.mxu0  ;;  %v2122_v23 = vpop.f32.mrf.mxu1 }
 0x215   : > { %v2459_v33 = vmax.f32 %v2443_v15, %v2120_v38  ;;  %v2428_v43 = vmax.f32 %v2412_v54, %v1965_v13  ;;  %2536 = vmax.xlane.f32.xlu1 %v2474_v28  ;;  %v2553_v38 = vld [vmem:[%s4653_s2 + $0x38] sm:$0xff]  ;;  %v2554_v15 = vld [vmem:[%s4653_s2 + $0x40] sm:$0xff] }
 0x216   : > { %v1967_v59 = vpop.f32.mrf.mxu0  ;;  %v2126_v30 = vpop.f32.mrf.mxu1 }
 0x217   : > { %v2475_v55 = vmax.f32 %v2459_v33, %v2122_v23  ;;  %v2444_v52 = vmax.f32 %v2428_v43, %v1967_v59  ;;  %v2555_v43 = vld [vmem:[%s4653_s2 + $0x48] sm:$0xff] }
 0x218   : > { %v1971_v36 = vpop.f32.mrf.mxu0  ;;  %v2128_v4 = vpop.f32.mrf.mxu1 }
 0x219   : > { %v2460_v19 = vmax.f32 %v2444_v52, %v2126_v30  ;;  %v2429_v34 = vmax.f32 %v2413_v5, %v1971_v36  ;;  %2538 = vmax.xlane.f32.xlu0 %v2475_v55  ;;  %v2556_v5 = vld [vmem:[%s4653_s2 + $0x50] sm:$0xff]  ;;  %v2557_v52 = vld [vmem:[%s4653_s2 + $0x58] sm:$0xff] }
 0x21a   : > { %v1973_v39 = vpop.f32.mrf.mxu0  ;;  %v2132_v31 = vpop.f32.mrf.mxu1 }
 0x21b   : > { %v2476_v26 = vmax.f32 %v2460_v19, %v2128_v4  ;;  %v2445_v49 = vmax.f32 %v2429_v34, %v1973_v39  ;;  %v2558_v34 = vld [vmem:[%s4653_s2 + $0x60] sm:$0xff] }
 0x21c   : > { %v1977_v42 = vpop.f32.mrf.mxu0  ;;  %v2134_v9 = vpop.f32.mrf.mxu1 }
 0x21d   : > { %v2461_v25 = vmax.f32 %v2445_v49, %v2132_v31  ;;  %v2430_v44 = vmax.f32 %v2414_v21, %v1977_v42  ;;  %2540 = vmax.xlane.f32.xlu1 %v2476_v26  ;;  %v2559_v26 = vld [vmem:[%s4653_s2 + $0x68] sm:$0xff] }
 0x21e   : > { %v1979_v40 = vpop.f32.mrf.mxu0  ;;  %v2138_v7 = vpop.f32.mrf.mxu1 }
 0x21f   : > { %v2477_v57 = vmax.f32 %v2461_v25, %v2134_v9  ;;  %v2446_v8 = vmax.f32 %v2430_v44, %v1979_v40  ;;  %v2560_v25 = vld [vmem:[%s4653_s2 + $0x70] sm:$0xff] }
 0x220   : > { %v2140_v0 = vpop.f32.mrf.mxu1 }
 0x221   : > { %v2462_v47 = vmax.f32 %v2446_v8, %v2138_v7  ;;  %2542 = vmax.xlane.f32.xlu0 %v2477_v57  ;;  %v2561_v57 = vld [vmem:[%s4653_s2 + $0x78] sm:$0xff] }
 0x223   : > { %v2478_v22 = vmax.f32 %v2462_v47, %v2140_v0 }
 0x225   : > { %2544 = vmax.xlane.f32.xlu1 %v2478_v22 }
 0x272   : > { %v2515_v20 = vpop.xlane.xlu0 %2514 }
 0x273   : > { %v2562_v2 = vadd.f32 %v2546_v18, %v2515_v20 }
 0x275   : > { %v2578_v46 = vmax.f32 %v2562_v2, 0.0  ;;  %v2595_v2 = vld [vmem:[%s4654_s3 + $0x8] sm:$0xff] }
 0x276   : > { %v2517_v53 = vpop.xlane.xlu1 %2516 }
 0x277   : > { %v2563_v29 = vadd.f32 %v2547_v17, %v2517_v53  ;;  %2612 = vperm.xlu0 %3078, %v2578_v46   ;;  %v2594_v17 = vld [vmem:[%s4654_s3] sm:$0xff]  ;;  %v2596_v46 = vld [vmem:[%s4654_s3 + $0x10] sm:$0xff] }
 0x279   : > { %v2579_v14 = vmax.f32 %v2563_v29, 0.0 }
 0x27a   : > { %v2519_v62 = vpop.xlane.xlu1 %2518 }
 0x27b   : > { %v2564_v60 = vadd.f32 %v2548_v63, %v2519_v62  ;;  %2617 = vperm.xlu1 %3079, %v2579_v14   ;;  %v2597_v63 = vld [vmem:[%s4654_s3 + $0x18] sm:$0xff] }
 0x27d   : > { %v2580_v24 = vmax.f32 %v2564_v60, 0.0 }
 0x27e   : > { %v2521_v27 = vpop.xlane.xlu1 %2520 }
 0x27f   : > { %v2565_v37 = vadd.f32 %v2549_v51, %v2521_v27  ;;  %2622 = vperm.xlu1 %3079, %v2580_v24   ;;  %v2598_v51 = vld [vmem:[%s4654_s3 + $0x20] sm:$0xff] }
 0x281   : > { %v2581_v45 = vmax.f32 %v2565_v37, 0.0 }
 0x282   : > { %v2523_v41 = vpop.xlane.xlu1 %2522 }
 0x283   : > { %v2566_v3 = vadd.f32 %v2550_v1, %v2523_v41  ;;  %2627 = vperm.xlu0 %3078, %v2581_v45   ;;  %v2599_v1 = vld [vmem:[%s4654_s3 + $0x28] sm:$0xff] }
 0x285   : > { %v2582_v11 = vmax.f32 %v2566_v3, 0.0 }
 0x286   : > { %v2525_v50 = vpop.xlane.xlu1 %2524 }
 0x287   : > { %v2567_v56 = vadd.f32 %v2551_v10, %v2525_v50  ;;  %2632 = vperm.xlu1 %3079, %v2582_v11   ;;  %v2600_v50 = vld [vmem:[%s4654_s3 + $0x30] sm:$0xff] }
 0x289   : > { %v2583_v35 = vmax.f32 %v2567_v56, 0.0 }
 0x28a   : > { %v2527_v54 = vpop.xlane.xlu1 %2526 }
 0x28b   : > { %v2568_v58 = vadd.f32 %v2552_v32, %v2527_v54  ;;  %2637 = vperm.xlu0 %3078, %v2583_v35  }
 0x28d   : > { %v2584_v61 = vmax.f32 %v2568_v58, 0.0  ;;  %v2601_v58 = vld [vmem:[%s4654_s3 + $0x38] sm:$0xff] }
 0x28e   : > { %v2529_v12 = vpop.xlane.xlu1 %2528 }
 0x28f   : > { %v2569_v28 = vadd.f32 %v2553_v38, %v2529_v12  ;;  %2642 = vperm.xlu1 %3079, %v2584_v61  }
 0x291   : > { %v2585_v13 = vmax.f32 %v2569_v28, 0.0 }
 0x292   : > { %v2531_v23 = vpop.xlane.xlu1 %2530 }
 0x293   : > { %v2570_v33 = vadd.f32 %v2554_v15, %v2531_v23  ;;  %2647 = vperm.xlu0 %3078, %v2585_v13   ;;  %v2602_v15 = vld [vmem:[%s4654_s3 + $0x40] sm:$0xff] }
 0x295   : > { %v2586_v59 = vmax.f32 %v2570_v33, 0.0 }
 0x296   : > { %v2533_v30 = vpop.xlane.xlu1 %2532 }
 0x297   : > { %v2571_v6 = vadd.f32 %v2555_v43, %v2533_v30  ;;  %2652 = vperm.xlu1 %3079, %v2586_v59   ;;  %v2603_v59 = vld [vmem:[%s4654_s3 + $0x48] sm:$0xff] }
 0x299   : > { %v2587_v16 = vmax.f32 %v2571_v6, 0.0 }
 0x29a   : > { %v2535_v48 = vpop.xlane.xlu0 %2534 }
 0x29b   : > { %v2572_v55 = vadd.f32 %v2556_v5, %v2535_v48  ;;  %2657 = vperm.xlu0 %3078, %v2587_v16   ;;  %v2604_v48 = vld [vmem:[%s4654_s3 + $0x50] sm:$0xff] }
 0x29d   : > { %v2588_v36 = vmax.f32 %v2572_v55, 0.0 }
 0x29e   : > { %v2537_v4 = vpop.xlane.xlu1 %2536 }
 0x29f   : > { %v2573_v19 = vadd.f32 %v2557_v52, %v2537_v4  ;;  %2662 = vperm.xlu1 %3079, %v2588_v36  }
 0x2a1   : > { %v2589_v39 = vmax.f32 %v2573_v19, 0.0  ;;  %v2605_v19 = vld [vmem:[%s4654_s3 + $0x58] sm:$0xff] }
 0x2a2   : > { %v2539_v31 = vpop.xlane.xlu0 %2538 }
 0x2a3   : > { %v2574_v21 = vadd.f32 %v2558_v34, %v2539_v31  ;;  %2667 = vperm.xlu0 %3078, %v2589_v39  }
 0x2a5   : > { %v2590_v49 = vmax.f32 %v2574_v21, 0.0 }
 0x2a6   : > { %v2541_v42 = vpop.xlane.xlu1 %2540 }
 0x2a7   : > { %v2575_v9 = vadd.f32 %v2559_v26, %v2541_v42  ;;  %2672 = vperm.xlu1 %3079, %v2590_v49   ;;  %v2606_v26 = vld [vmem:[%s4654_s3 + $0x60] sm:$0xff] }
 0x2a9   : > { %v2591_v44 = vmax.f32 %v2575_v9, 0.0 }
 0x2aa   : > { %v2543_v40 = vpop.xlane.xlu0 %2542 }
 0x2ab   : > { %v2576_v7 = vadd.f32 %v2560_v25, %v2543_v40  ;;  %2677 = vperm.xlu0 %3078, %v2591_v44   ;;  %v2607_v44 = vld [vmem:[%s4654_s3 + $0x68] sm:$0xff] }
 0x2ad   : > { %v2592_v8 = vmax.f32 %v2576_v7, 0.0 }
 0x2ae   : > { %v2545_v47 = vpop.xlane.xlu1 %2544 }
 0x2af   : > { %v2577_v0 = vadd.f32 %v2561_v57, %v2545_v47  ;;  %2682 = vperm.xlu1 %3079, %v2592_v8  }
 0x2b1   : > { %v2593_v22 = vmax.f32 %v2577_v0, 0.0 }
 0x2b3   : > { %2687 = vperm.xlu0 %3078, %v2593_v22  }
 0x2f2   : > { %v2613_v20 = vpop.permute.xlu0 %2612 }
 0x2f3   : > { %v2690_v62 = vmul.f32 %v2613_v20, %v2594_v17 }
 0x2f5   : > { %v2707_v41 = vsel %vm2706_vm3, %v2690_v62, 0.0 }
 0x2f6   : > { %v2618_v18 = vpop.permute.xlu1 %2617 }
 0x2f7   : > { %v2691_v29 = vmul.f32 %v2618_v18, %v2595_v2  ;;  %v2608_v18 = vld [vmem:[%s4654_s3 + $0x70] sm:$0xff] }
 0x2f9   : > { %v2708_v27 = vsel %vm2706_vm3, %v2691_v29, 0.0 }
 0x2fa   : > { %v2623_v53 = vpop.permute.xlu1 %2622  ;;  %v2709_v11 = vadd.f32 %v2708_v27, %v2707_v41 }
 0x2fb   : > { %v2692_v60 = vmul.f32 %v2623_v53, %v2596_v46 }
 0x2fd   : > { %v2710_v3 = vsel %vm2706_vm3, %v2692_v60, 0.0 }
 0x2fe   : > { %v2628_v14 = vpop.permute.xlu0 %2627  ;;  %v2711_v54 = vadd.f32 %v2710_v3, %v2709_v11  ;;  %v2744_v11 = vld [vmem:[%s4655_s4] sm:$0x1] }
 0x2ff   : > { %v2693_v37 = vmul.f32 %v2628_v14, %v2597_v63  ;;  %v2609_v63 = vld [vmem:[%s4654_s3 + $0x78] sm:$0xff] }
 0x301   : > { %v2712_v32 = vsel %vm2706_vm3, %v2693_v37, 0.0 }
 0x302   : > { %v2633_v24 = vpop.permute.xlu1 %2632  ;;  %v2713_v28 = vadd.f32 %v2712_v32, %v2711_v54 }
 0x303   : > { %v2694_v10 = vmul.f32 %v2633_v24, %v2598_v51 }
 0x305   : > { %v2714_v61 = vsel %vm2706_vm3, %v2694_v10, 0.0 }
 0x306   : > { %v2638_v45 = vpop.permute.xlu0 %2637  ;;  %v2715_v43 = vadd.f32 %v2714_v61, %v2713_v28 }
 0x307   : > { %v2695_v35 = vmul.f32 %v2638_v45, %v2599_v1 }
 0x309   : > { %v2716_v23 = vsel %vm2706_vm3, %v2695_v35, 0.0 }
 0x30a   : > { %v2643_v56 = vpop.permute.xlu1 %2642  ;;  %v2717_v16 = vadd.f32 %v2716_v23, %v2715_v43 }
 0x30b   : > { %v2696_v12 = vmul.f32 %v2643_v56, %v2600_v50 }
 0x30d   : > { %v2718_v6 = vsel %vm2706_vm3, %v2696_v12, 0.0 }
 0x30e   : > { %v2648_v38 = vpop.permute.xlu0 %2647  ;;  %v2719_v4 = vadd.f32 %v2718_v6, %v2717_v16 }
 0x30f   : > { %v2697_v33 = vmul.f32 %v2648_v38, %v2601_v58 }
 0x311   : > { %v2720_v52 = vsel %vm2706_vm3, %v2697_v33, 0.0 }
 0x312   : > { %v2653_v13 = vpop.permute.xlu1 %2652  ;;  %v2721_v21 = vadd.f32 %v2720_v52, %v2719_v4 }
 0x313   : > { %v2698_v5 = vmul.f32 %v2653_v13, %v2602_v15 }
 0x315   : > { %v2722_v39 = vsel %vm2706_vm3, %v2698_v5, 0.0 }
 0x316   : > { %v2658_v30 = vpop.permute.xlu0 %2657  ;;  %v2723_v25 = vadd.f32 %v2722_v39, %v2721_v21 }
 0x317   : > { %v2699_v36 = vmul.f32 %v2658_v30, %v2603_v59 }
 0x319   : > { %v2724_v42 = vsel %vm2706_vm3, %v2699_v36, 0.0 }
 0x31a   : > { %v2663_v55 = vpop.permute.xlu1 %2662  ;;  %v2725_v57 = vadd.f32 %v2724_v42, %v2723_v25 }
 0x31b   : > { %v2700_v31 = vmul.f32 %v2663_v55, %v2604_v48 }
 0x31d   : > { %v2726_v40 = vsel %vm2706_vm3, %v2700_v31, 0.0 }
 0x31e   : > { %v2668_v34 = vpop.permute.xlu0 %2667  ;;  %v2727_v22 = vadd.f32 %v2726_v40, %v2725_v57 }
 0x31f   : > { %v2701_v9 = vmul.f32 %v2668_v34, %v2605_v19 }
 0x321   : > { %v2728_v47 = vsel %vm2706_vm3, %v2701_v9, 0.0 }
 0x322   : > { %v2673_v49 = vpop.permute.xlu1 %2672  ;;  %v2729_v2 = vadd.f32 %v2728_v47, %v2727_v22 }
 0x323   : > { %v2702_v7 = vmul.f32 %v2673_v49, %v2606_v26 }
 0x325   : > { %v2730_v20 = vsel %vm2706_vm3, %v2702_v7, 0.0 }
 0x326   : > { %v2678_v8 = vpop.permute.xlu0 %2677  ;;  %v2731_v29 = vadd.f32 %v2730_v20, %v2729_v2 }
 0x327   : > { %v2703_v0 = vmul.f32 %v2678_v8, %v2607_v44 }
 0x329   : > { %v2732_v46 = vsel %vm2706_vm3, %v2703_v0, 0.0 }
 0x32a   : > { %v2683_v17 = vpop.permute.xlu1 %2682  ;;  %v2733_v62 = vadd.f32 %v2732_v46, %v2731_v29 }
 0x32b   : > { %v2704_v53 = vmul.f32 %v2683_v17, %v2608_v18 }
 0x32d   : > { %v2734_v14 = vsel %vm2706_vm3, %v2704_v53, 0.0 }
 0x32e   : > { %v2688_v60 = vpop.permute.xlu0 %2687  ;;  %v2735_v24 = vadd.f32 %v2734_v14, %v2733_v62 }
 0x32f   : > { %v2705_v51 = vmul.f32 %v2688_v60, %v2609_v63 }
 0x331   : > { %v2736_v27 = vsel %vm2706_vm3, %v2705_v51, 0.0 }
 0x332   : > { %v2737_v37 = vadd.f32 %v2736_v27, %v2735_v24 }
 0x334   : > { %v2738_v1 = vrot.slane %v2737_v37, 4 }
 0x336   : > { %v2739_v45 = vadd.f32 %v2738_v1, %v2737_v37 }
 0x338   : > { %v2740_v41 = vrot.slane %v2739_v45, 2 }
 0x33a   : > { %v2741_v3 = vadd.f32 %v2740_v41, %v2739_v45 }
 0x33c   : > { %v2742_v10 = vrot.slane %v2741_v3, 1 }
 0x33e   : > { %v2743_v50 = vadd.f32 %v2742_v10, %v2741_v3 }
 0x340   : > { %v2745_v56 = vadd.f32 %v2744_v11, %v2743_v50 }
 0x342   : > { %2747 = vst.msk [vmem:[%s239_s15] sm:$0x1] %vm2746_vm4, %v2745_v56 }
 0x343   : > { %3106 = shalt.err (!%p3103_p5)
}
 0x344   : > { %s3107_s8 = scalar_lea.hbm %s2759_s24, 16  ;;  %s3111_s12 = scalar_lea.hbm %s4656_s5, 32 }
 0x345   : > { %p3108_p6 = scmp.ne.s32.totalorder %s2759_s24, %s3107_s8  ;;  %p3112_p10 = scmp.lt.s32.totalorder %s2759_s24, %s4656_s5 }
 0x346   : > { %p3113_p11 = scmp.lt.s32.totalorder %s3111_s12, %s3107_s8 }
 0x347   : > { %p3109_p7 = pnand %p3108_p6, %p3245_p4 }
 0x348   : > { %p3114_p12 = por %p3113_p11, %p3112_p10 }
 0x349   : > { %p3110_p9 = pneg %p3109_p7 }
 0x34b   : > { %p3115_p13 = pnand %p3114_p12, %p3110_p9 }
 0x34d   : > { %3118 = shalt.err (!%p3115_p13)
}
 0x34e   : > { %3020 = dma.vmem_to_hbm [thread:$0]  (%p3245_p4), %s2762_s11, 16, %s2759_s24, %s2749_s25  }
 0x34f PF: > { %p3026_p0 = scmp.ge.s32.totalorder %s3169_s23, 2  ;;  %s2773_s15 = sand.u32 1, %s3149_s18  }
 0x350   : > { %s2774_s16 = scalar_lea.sflag [#allocation4], %s2773_s15 }
 0x351   : > { %p3023_p1 = pnand %p3026_p0, %p3252_p8 }
 0x353   : > { %p3024_p2 = pneg %p3023_p1 }
 0x355   : > { %3144 = dma.done.wait (%p3024_p2), %s2774_s16, 16  }
 0x356   : > { %3146 = vsyncadd (%p3024_p2), %s2774_s16, 4294967280  ;;  %s18_s23 = sadd.s32 1, %s3169_s23   ;;  %s4762_s18 = smov %s3153_s19 }
 0x357   : > { %p15_p3 = scmp.ge.s32.totalorder %s18_s23, 4   ;;  %s4763_s19 = smov %s3157_s20 }
 0x358   : > { %s4764_s20 = smov %s3258_s6  ;;  %s4765_s21 = smov %s3165_s22 }
 0x359   : > { %s4766_s22 = smov %s4768_s26  ;;  %17 = sbr.rel (!%p15_p3) target bundleno = 4 (0x4), region = 83 }
 0x35e   :  { %2778 = vsyncpa [#allocation4], 1 }
 0x35f   :  { %2780 = vsyncpa [#allocation4 + $0x1], 1 }

</bundles_post_ra>
